<compile_context>
chip_gen: v6e
topology: v6e:2x2x1
jax: 0.10.0
libtpu: 0.0.40
codegen_flags: <defaults>
</compile_context>

<pallas_src>
import jax
import jax.numpy as jnp
from jax.experimental import pallas as pl
from jax.experimental.pallas import tpu as pltpu

BN_EPS = 1e-5


def _vmem():
    return pl.BlockSpec(memory_space=pltpu.MemorySpace.VMEM)


# ---------------------------------------------------------------------------
# Kernel 1: fused conv (matmul) + BatchNorm2d (batch stats) + ReLU + 2x2 pool
# ---------------------------------------------------------------------------
def _conv_stage_kernel(p_ref, w_ref, g_ref, beta_ref, o_ref):
    # p_ref:    (4, K, Mp) bf16  -- one im2col patch matrix per 2x2 pool offset
    # w_ref:    (Cout, K)  bf16  -- conv weights, K = Cin*KH*KW
    # g_ref:    (Cout, 1)  f32   -- BN gamma
    # beta_ref: (Cout, 1)  f32   -- BN beta
    # o_ref:    (Cout, Mp) bf16  -- pooled output; Mp = B*PH*PW on lanes
    w = w_ref[...]
    Mp = p_ref.shape[2]
    inv_n = 1.0 / (4.0 * Mp)            # total conv positions per channel

    # Four conv outputs (one per pooling offset); f32 accumulation on the MXU.
    ys = [jnp.dot(w, p_ref[i], preferred_element_type=jnp.float32)
          for i in range(4)]                                    # 4 x (Cout, Mp)

    # Single-pass BatchNorm batch statistics over all 4*Mp conv positions.
    # (Conv bias omitted: the batch-mean subtraction cancels it exactly.)
    s = jnp.sum(ys[0] + ys[1] + ys[2] + ys[3], axis=1, keepdims=True)
    ssq = (jnp.sum(ys[0] * ys[0], axis=1, keepdims=True)
           + jnp.sum(ys[1] * ys[1], axis=1, keepdims=True)
           + jnp.sum(ys[2] * ys[2], axis=1, keepdims=True)
           + jnp.sum(ys[3] * ys[3], axis=1, keepdims=True))
    mean = s * inv_n
    var = jnp.maximum(ssq * inv_n - mean * mean, 0.0)           # biased var
    scale = g_ref[...] * jax.lax.rsqrt(var + BN_EPS)            # (Cout, 1)
    shift = beta_ref[...] - mean * scale

    zs = [jnp.maximum(y * scale + shift, 0.0) for y in ys]      # BN + ReLU
    pooled = jnp.maximum(jnp.maximum(zs[0], zs[1]),
                         jnp.maximum(zs[2], zs[3]))             # 2x2 max-pool
    o_ref[...] = pooled.astype(o_ref.dtype)


def conv_stage(patches, w, gamma, beta):
    Cout = w.shape[0]
    Mp = patches.shape[2]
    return pl.pallas_call(
        _conv_stage_kernel,
        out_shape=jax.ShapeDtypeStruct((Cout, Mp), jnp.bfloat16),
        in_specs=[_vmem()] * 4,
        out_specs=_vmem(),
    )(patches, w, gamma, beta)


# ---------------------------------------------------------------------------
# Kernel 2: fused MLP head  fc1+ReLU (dropout p=0.0 == identity), fc2+ReLU, fc3
# ---------------------------------------------------------------------------
def _mlp_kernel(x_ref, w1_ref, b1_ref, w2_ref, b2_ref, w3_ref, b3_ref, o_ref):
    h = jnp.dot(x_ref[...], w1_ref[...], preferred_element_type=jnp.float32)
    h = jnp.maximum(h + b1_ref[...], 0.0)                       # fc1 + ReLU
    # dropout_rate = 0.0 -> identity, nothing to do.
    h = jnp.dot(h.astype(jnp.bfloat16), w2_ref[...],
                preferred_element_type=jnp.float32)
    h = jnp.maximum(h + b2_ref[...], 0.0)                       # fc2 + ReLU
    o_ref[...] = (jnp.dot(h.astype(jnp.bfloat16), w3_ref[...],
                          preferred_element_type=jnp.float32)
                  + b3_ref[...])                                # fc3


def mlp_head(x, w1, b1, w2, b2, w3, b3):
    B = x.shape[0]
    A = w3.shape[1]
    return pl.pallas_call(
        _mlp_kernel,
        out_shape=jax.ShapeDtypeStruct((B, A), jnp.float32),
        in_specs=[_vmem()] * 7,
        out_specs=_vmem(),
    )(x.astype(jnp.bfloat16), w1, b1, w2, b2, w3, b3)


# ---------------------------------------------------------------------------
# Glue: strided im2col patch extraction (pure data rearrangement, host/XLA)
# ---------------------------------------------------------------------------
def _pool_patches(x_cbhw, KH, KW):
    # x_cbhw: (Cin, B, H, W)  ->  (4, Cin*KH*KW, B*PH*PW) bf16,
    # where PH = (H-KH+1)//2, PW = (W-KW+1)//2 and axis 0 enumerates the
    # 2x2-pooling offsets (dy, dx).  Patch row order (cin, kh, kw) matches
    # conv_w.reshape(Cout, Cin*KH*KW).
    Cin, B, H, W = x_cbhw.shape
    OH, OW = H - KH + 1, W - KW + 1
    PH, PW = OH // 2, OW // 2
    mats = []
    for dy in range(2):
        for dx in range(2):
            cols = []
            for kh in range(KH):
                for kw in range(KW):
                    sl = x_cbhw[:, :,
                                dy + kh: dy + kh + 2 * PH: 2,
                                dx + kw: dx + kw + 2 * PW: 2]   # (Cin,B,PH,PW)
                    cols.append(sl)
            p = jnp.stack(cols, axis=1)              # (Cin, KH*KW, B, PH, PW)
            mats.append(p.reshape(Cin * KH * KW, B * PH * PW))
    return jnp.stack(mats, axis=0).astype(jnp.bfloat16)


# ---------------------------------------------------------------------------
# Parameters (deterministic, PyTorch-default-like uniform init), kernel-ready
# ---------------------------------------------------------------------------
def init_params(key, action_size):
    ks = jax.random.split(key, 8)

    def u(k, shape, fan_in):
        bound = 1.0 / float(fan_in) ** 0.5
        return jax.random.uniform(k, shape, jnp.float32, -bound, bound)

    return {
        # Conv weights stored kernel-ready as (Cout, Cin*KH*KW) bf16.
        # Conv biases are omitted: BatchNorm's batch-mean subtraction cancels
        # a per-output-channel constant exactly.
        "conv1_w": u(ks[0], (6, 3, 5, 5), 3 * 5 * 5).reshape(6, 75).astype(jnp.bfloat16),
        "bn1_g": jnp.ones((6, 1), jnp.float32),
        "bn1_b": jnp.zeros((6, 1), jnp.float32),
        "conv2_w": u(ks[1], (16, 6, 5, 5), 6 * 5 * 5).reshape(16, 150).astype(jnp.bfloat16),
        "bn2_g": jnp.ones((16, 1), jnp.float32),
        "bn2_b": jnp.zeros((16, 1), jnp.float32),
        # fc weights stored as (in_features, out_features) bf16; biases f32.
        "fc1_w": u(ks[2], (16 * 5 * 5, 120), 16 * 5 * 5).astype(jnp.bfloat16),
        "fc1_b": u(ks[3], (1, 120), 16 * 5 * 5),
        "fc2_w": u(ks[4], (120, 84), 120).astype(jnp.bfloat16),
        "fc2_b": u(ks[5], (1, 84), 120),
        "fc3_w": u(ks[6], (84, action_size), 84).astype(jnp.bfloat16),
        "fc3_b": u(ks[7], (1, action_size), 84),
    }


# ---------------------------------------------------------------------------
# Full forward pass (mirrors LeNet.forward)
# ---------------------------------------------------------------------------
def lenet_forward(params, x):
    x = x.reshape(-1, 3, 32, 32).astype(jnp.float32)         # x.view(-1, 3, 32, 32)
    B = x.shape[0]

    # Channel-first (Cin, B, H, W) layout: one transpose of the raw input only.
    xc = x.transpose(1, 0, 2, 3)

    # stage 1: conv1 -> bn1 -> relu -> maxpool2   (one fused kernel)
    p1 = _pool_patches(xc, 5, 5)                              # (4, 75, B*14*14)
    y1 = conv_stage(p1, params["conv1_w"], params["bn1_g"], params["bn1_b"])
    x2 = y1.reshape(6, B, 14, 14)                             # already (C,B,H,W); no transpose

    # stage 2: conv2 -> bn2 -> relu -> maxpool2   (one fused kernel)
    p2 = _pool_patches(x2, 5, 5)                              # (4, 150, B*5*5)
    y2 = conv_stage(p2, params["conv2_w"], params["bn2_g"], params["bn2_b"])

    # flatten in PyTorch (C, H, W) order (tiny: B*400 elements)
    feat = y2.reshape(16, B, 5, 5).transpose(1, 0, 2, 3).reshape(B, 16 * 5 * 5)

    # fc1 -> relu -> dropout(0.0) -> fc2 -> relu -> fc3   (one fused kernel)
    return mlp_head(feat,
                    params["fc1_w"], params["fc1_b"],
                    params["fc2_w"], params["fc2_b"],
                    params["fc3_w"], params["fc3_b"])


if __name__ == "__main__":
    key = jax.random.PRNGKey(0)
    k_param, k_x = jax.random.split(key)

    action_size = 10
    batch = 2
    params = init_params(k_param, action_size)
    x = jax.random.normal(k_x, (batch, 3, 32, 32), dtype=jnp.float32)

    out = jax.jit(lenet_forward)(params, x)
    out = jax.block_until_ready(out)

    assert out.shape == (batch, action_size), out.shape
    assert bool(jnp.all(jnp.isfinite(out)))
    print("KERNEL_OK")
</pallas_src>

<mosaic_0001>
module attributes {stable_mosaic.version = 11 : i64} {
  func.func @_conv_stage_kernel(%arg0: memref<4x75x392xbf16, #tpu.memory_space<vmem>>, %arg1: memref<6x75xbf16, #tpu.memory_space<vmem>>, %arg2: memref<6x1xf32, #tpu.memory_space<vmem>>, %arg3: memref<6x1xf32, #tpu.memory_space<vmem>>, %arg4: memref<6x392xbf16, #tpu.memory_space<vmem>>) attributes {dimension_semantics = [], scalar_prefetch = 0 : i64, scratch_operands = 0 : i64, tpu.core_type = #tpu.core_type<tc>} {
    %c0 = arith.constant 0 : index
    %c0_0 = arith.constant 0 : index
    %0 = vector.load %arg1[%c0, %c0_0] : memref<6x75xbf16, #tpu.memory_space<vmem>>, vector<6x75xbf16>
    %c0_1 = arith.constant 0 : index
    %c0_2 = arith.constant 0 : index
    %c0_3 = arith.constant 0 : index
    %1 = vector.load %arg0[%c0_1, %c0_2, %c0_3] : memref<4x75x392xbf16, #tpu.memory_space<vmem>>, vector<1x75x392xbf16>
    %2 = vector.shape_cast %1 : vector<1x75x392xbf16> to vector<75x392xbf16>
    %cst = arith.constant dense<0.000000e+00> : vector<6x392xf32>
    %3 = tpu.matmul %0, %2, %cst {dimension_numbers = #tpu.dot_dimension_numbers<[1], [0], [0], [1], [0, 0, 1, 1], [], []>} : vector<6x75xbf16>, vector<75x392xbf16>, vector<6x392xf32> -> vector<6x392xf32>
    %c1 = arith.constant 1 : index
    %c0_4 = arith.constant 0 : index
    %c0_5 = arith.constant 0 : index
    %4 = vector.load %arg0[%c1, %c0_4, %c0_5] : memref<4x75x392xbf16, #tpu.memory_space<vmem>>, vector<1x75x392xbf16>
    %5 = vector.shape_cast %4 : vector<1x75x392xbf16> to vector<75x392xbf16>
    %cst_6 = arith.constant dense<0.000000e+00> : vector<6x392xf32>
    %6 = tpu.matmul %0, %5, %cst_6 {dimension_numbers = #tpu.dot_dimension_numbers<[1], [0], [0], [1], [0, 0, 1, 1], [], []>} : vector<6x75xbf16>, vector<75x392xbf16>, vector<6x392xf32> -> vector<6x392xf32>
    %c2 = arith.constant 2 : index
    %c0_7 = arith.constant 0 : index
    %c0_8 = arith.constant 0 : index
    %7 = vector.load %arg0[%c2, %c0_7, %c0_8] : memref<4x75x392xbf16, #tpu.memory_space<vmem>>, vector<1x75x392xbf16>
    %8 = vector.shape_cast %7 : vector<1x75x392xbf16> to vector<75x392xbf16>
    %cst_9 = arith.constant dense<0.000000e+00> : vector<6x392xf32>
    %9 = tpu.matmul %0, %8, %cst_9 {dimension_numbers = #tpu.dot_dimension_numbers<[1], [0], [0], [1], [0, 0, 1, 1], [], []>} : vector<6x75xbf16>, vector<75x392xbf16>, vector<6x392xf32> -> vector<6x392xf32>
    %c3 = arith.constant 3 : index
    %c0_10 = arith.constant 0 : index
    %c0_11 = arith.constant 0 : index
    %10 = vector.load %arg0[%c3, %c0_10, %c0_11] : memref<4x75x392xbf16, #tpu.memory_space<vmem>>, vector<1x75x392xbf16>
    %11 = vector.shape_cast %10 : vector<1x75x392xbf16> to vector<75x392xbf16>
    %cst_12 = arith.constant dense<0.000000e+00> : vector<6x392xf32>
    %12 = tpu.matmul %0, %11, %cst_12 {dimension_numbers = #tpu.dot_dimension_numbers<[1], [0], [0], [1], [0, 0, 1, 1], [], []>} : vector<6x75xbf16>, vector<75x392xbf16>, vector<6x392xf32> -> vector<6x392xf32>
    %13 = arith.addf %3, %6 : vector<6x392xf32>
    %14 = arith.addf %13, %9 : vector<6x392xf32>
    %15 = arith.addf %14, %12 : vector<6x392xf32>
    %cst_13 = arith.constant dense<0.000000e+00> : vector<6xf32>
    %16 = vector.multi_reduction <add>, %15, %cst_13 [1] : vector<6x392xf32> to vector<6xf32>
    %17 = vector.shape_cast %16 : vector<6xf32> to vector<6x1xf32>
    %18 = arith.mulf %3, %3 : vector<6x392xf32>
    %cst_14 = arith.constant dense<0.000000e+00> : vector<6xf32>
    %19 = vector.multi_reduction <add>, %18, %cst_14 [1] : vector<6x392xf32> to vector<6xf32>
    %20 = vector.shape_cast %19 : vector<6xf32> to vector<6x1xf32>
    %21 = arith.mulf %6, %6 : vector<6x392xf32>
    %cst_15 = arith.constant dense<0.000000e+00> : vector<6xf32>
    %22 = vector.multi_reduction <add>, %21, %cst_15 [1] : vector<6x392xf32> to vector<6xf32>
    %23 = vector.shape_cast %22 : vector<6xf32> to vector<6x1xf32>
    %24 = arith.addf %20, %23 : vector<6x1xf32>
    %25 = arith.mulf %9, %9 : vector<6x392xf32>
    %cst_16 = arith.constant dense<0.000000e+00> : vector<6xf32>
    %26 = vector.multi_reduction <add>, %25, %cst_16 [1] : vector<6x392xf32> to vector<6xf32>
    %27 = vector.shape_cast %26 : vector<6xf32> to vector<6x1xf32>
    %28 = arith.addf %24, %27 : vector<6x1xf32>
    %29 = arith.mulf %12, %12 : vector<6x392xf32>
    %cst_17 = arith.constant dense<0.000000e+00> : vector<6xf32>
    %30 = vector.multi_reduction <add>, %29, %cst_17 [1] : vector<6x392xf32> to vector<6xf32>
    %31 = vector.shape_cast %30 : vector<6xf32> to vector<6x1xf32>
    %32 = arith.addf %28, %31 : vector<6x1xf32>
    %cst_18 = arith.constant 6.37755089E-4 : f32
    %33 = vector.broadcast %cst_18 : f32 to vector<6x1xf32>
    %34 = arith.mulf %17, %33 : vector<6x1xf32>
    %cst_19 = arith.constant 6.37755089E-4 : f32
    %35 = vector.broadcast %cst_19 : f32 to vector<6x1xf32>
    %36 = arith.mulf %32, %35 : vector<6x1xf32>
    %37 = arith.mulf %34, %34 : vector<6x1xf32>
    %38 = arith.subf %36, %37 : vector<6x1xf32>
    %cst_20 = arith.constant 0.000000e+00 : f32
    %39 = vector.broadcast %cst_20 : f32 to vector<6x1xf32>
    %40 = arith.maximumf %38, %39 : vector<6x1xf32>
    %c0_21 = arith.constant 0 : index
    %c0_22 = arith.constant 0 : index
    %41 = vector.load %arg2[%c0_21, %c0_22] : memref<6x1xf32, #tpu.memory_space<vmem>>, vector<6x1xf32>
    %cst_23 = arith.constant 9.99999974E-6 : f32
    %42 = vector.broadcast %cst_23 : f32 to vector<6x1xf32>
    %43 = arith.addf %40, %42 : vector<6x1xf32>
    %44 = math.rsqrt %43 : vector<6x1xf32>
    %45 = arith.mulf %41, %44 : vector<6x1xf32>
    %c0_24 = arith.constant 0 : index
    %c0_25 = arith.constant 0 : index
    %46 = vector.load %arg3[%c0_24, %c0_25] : memref<6x1xf32, #tpu.memory_space<vmem>>, vector<6x1xf32>
    %47 = arith.mulf %34, %45 : vector<6x1xf32>
    %48 = arith.subf %46, %47 : vector<6x1xf32>
    %49 = vector.broadcast %45 : vector<6x1xf32> to vector<6x392xf32>
    %50 = arith.mulf %3, %49 : vector<6x392xf32>
    %51 = vector.broadcast %48 : vector<6x1xf32> to vector<6x392xf32>
    %52 = arith.addf %50, %51 : vector<6x392xf32>
    %cst_26 = arith.constant 0.000000e+00 : f32
    %53 = vector.broadcast %cst_26 : f32 to vector<6x392xf32>
    %54 = arith.maximumf %52, %53 : vector<6x392xf32>
    %55 = vector.broadcast %45 : vector<6x1xf32> to vector<6x392xf32>
    %56 = arith.mulf %6, %55 : vector<6x392xf32>
    %57 = vector.broadcast %48 : vector<6x1xf32> to vector<6x392xf32>
    %58 = arith.addf %56, %57 : vector<6x392xf32>
    %cst_27 = arith.constant 0.000000e+00 : f32
    %59 = vector.broadcast %cst_27 : f32 to vector<6x392xf32>
    %60 = arith.maximumf %58, %59 : vector<6x392xf32>
    %61 = vector.broadcast %45 : vector<6x1xf32> to vector<6x392xf32>
    %62 = arith.mulf %9, %61 : vector<6x392xf32>
    %63 = vector.broadcast %48 : vector<6x1xf32> to vector<6x392xf32>
    %64 = arith.addf %62, %63 : vector<6x392xf32>
    %cst_28 = arith.constant 0.000000e+00 : f32
    %65 = vector.broadcast %cst_28 : f32 to vector<6x392xf32>
    %66 = arith.maximumf %64, %65 : vector<6x392xf32>
    %67 = vector.broadcast %45 : vector<6x1xf32> to vector<6x392xf32>
    %68 = arith.mulf %12, %67 : vector<6x392xf32>
    %69 = vector.broadcast %48 : vector<6x1xf32> to vector<6x392xf32>
    %70 = arith.addf %68, %69 : vector<6x392xf32>
    %cst_29 = arith.constant 0.000000e+00 : f32
    %71 = vector.broadcast %cst_29 : f32 to vector<6x392xf32>
    %72 = arith.maximumf %70, %71 : vector<6x392xf32>
    %73 = arith.maximumf %54, %60 : vector<6x392xf32>
    %74 = arith.maximumf %66, %72 : vector<6x392xf32>
    %75 = arith.maximumf %73, %74 : vector<6x392xf32>
    %76 = arith.truncf %75 : vector<6x392xf32> to vector<6x392xbf16>
    %c0_30 = arith.constant 0 : index
    %c0_31 = arith.constant 0 : index
    %77 = vector.load %arg4[%c0_30, %c0_31] : memref<6x392xbf16, #tpu.memory_space<vmem>>, vector<6x392xbf16>
    tpu.vector_store %arg4[%c0_30, %c0_31], %76 {strides = array<i32>} : memref<6x392xbf16, #tpu.memory_space<vmem>>, vector<6x392xbf16>,
    return
  }
}

module attributes {stable_mosaic.version = 11 : i64} {
  func.func @_conv_stage_kernel(%arg0: memref<4x150x50xbf16, #tpu.memory_space<vmem>>, %arg1: memref<16x150xbf16, #tpu.memory_space<vmem>>, %arg2: memref<16x1xf32, #tpu.memory_space<vmem>>, %arg3: memref<16x1xf32, #tpu.memory_space<vmem>>, %arg4: memref<16x50xbf16, #tpu.memory_space<vmem>>) attributes {dimension_semantics = [], scalar_prefetch = 0 : i64, scratch_operands = 0 : i64, tpu.core_type = #tpu.core_type<tc>} {
    %c0 = arith.constant 0 : index
    %c0_0 = arith.constant 0 : index
    %0 = vector.load %arg1[%c0, %c0_0] : memref<16x150xbf16, #tpu.memory_space<vmem>>, vector<16x150xbf16>
    %c0_1 = arith.constant 0 : index
    %c0_2 = arith.constant 0 : index
    %c0_3 = arith.constant 0 : index
    %1 = vector.load %arg0[%c0_1, %c0_2, %c0_3] : memref<4x150x50xbf16, #tpu.memory_space<vmem>>, vector<1x150x50xbf16>
    %2 = vector.shape_cast %1 : vector<1x150x50xbf16> to vector<150x50xbf16>
    %cst = arith.constant dense<0.000000e+00> : vector<16x50xf32>
    %3 = tpu.matmul %0, %2, %cst {dimension_numbers = #tpu.dot_dimension_numbers<[1], [0], [0], [1], [0, 0, 1, 1], [], []>} : vector<16x150xbf16>, vector<150x50xbf16>, vector<16x50xf32> -> vector<16x50xf32>
    %c1 = arith.constant 1 : index
    %c0_4 = arith.constant 0 : index
    %c0_5 = arith.constant 0 : index
    %4 = vector.load %arg0[%c1, %c0_4, %c0_5] : memref<4x150x50xbf16, #tpu.memory_space<vmem>>, vector<1x150x50xbf16>
    %5 = vector.shape_cast %4 : vector<1x150x50xbf16> to vector<150x50xbf16>
    %cst_6 = arith.constant dense<0.000000e+00> : vector<16x50xf32>
    %6 = tpu.matmul %0, %5, %cst_6 {dimension_numbers = #tpu.dot_dimension_numbers<[1], [0], [0], [1], [0, 0, 1, 1], [], []>} : vector<16x150xbf16>, vector<150x50xbf16>, vector<16x50xf32> -> vector<16x50xf32>
    %c2 = arith.constant 2 : index
    %c0_7 = arith.constant 0 : index
    %c0_8 = arith.constant 0 : index
    %7 = vector.load %arg0[%c2, %c0_7, %c0_8] : memref<4x150x50xbf16, #tpu.memory_space<vmem>>, vector<1x150x50xbf16>
    %8 = vector.shape_cast %7 : vector<1x150x50xbf16> to vector<150x50xbf16>
    %cst_9 = arith.constant dense<0.000000e+00> : vector<16x50xf32>
    %9 = tpu.matmul %0, %8, %cst_9 {dimension_numbers = #tpu.dot_dimension_numbers<[1], [0], [0], [1], [0, 0, 1, 1], [], []>} : vector<16x150xbf16>, vector<150x50xbf16>, vector<16x50xf32> -> vector<16x50xf32>
    %c3 = arith.constant 3 : index
    %c0_10 = arith.constant 0 : index
    %c0_11 = arith.constant 0 : index
    %10 = vector.load %arg0[%c3, %c0_10, %c0_11] : memref<4x150x50xbf16, #tpu.memory_space<vmem>>, vector<1x150x50xbf16>
    %11 = vector.shape_cast %10 : vector<1x150x50xbf16> to vector<150x50xbf16>
    %cst_12 = arith.constant dense<0.000000e+00> : vector<16x50xf32>
    %12 = tpu.matmul %0, %11, %cst_12 {dimension_numbers = #tpu.dot_dimension_numbers<[1], [0], [0], [1], [0, 0, 1, 1], [], []>} : vector<16x150xbf16>, vector<150x50xbf16>, vector<16x50xf32> -> vector<16x50xf32>
    %13 = arith.addf %3, %6 : vector<16x50xf32>
    %14 = arith.addf %13, %9 : vector<16x50xf32>
    %15 = arith.addf %14, %12 : vector<16x50xf32>
    %cst_13 = arith.constant dense<0.000000e+00> : vector<16xf32>
    %16 = vector.multi_reduction <add>, %15, %cst_13 [1] : vector<16x50xf32> to vector<16xf32>
    %17 = vector.shape_cast %16 : vector<16xf32> to vector<16x1xf32>
    %18 = arith.mulf %3, %3 : vector<16x50xf32>
    %cst_14 = arith.constant dense<0.000000e+00> : vector<16xf32>
    %19 = vector.multi_reduction <add>, %18, %cst_14 [1] : vector<16x50xf32> to vector<16xf32>
    %20 = vector.shape_cast %19 : vector<16xf32> to vector<16x1xf32>
    %21 = arith.mulf %6, %6 : vector<16x50xf32>
    %cst_15 = arith.constant dense<0.000000e+00> : vector<16xf32>
    %22 = vector.multi_reduction <add>, %21, %cst_15 [1] : vector<16x50xf32> to vector<16xf32>
    %23 = vector.shape_cast %22 : vector<16xf32> to vector<16x1xf32>
    %24 = arith.addf %20, %23 : vector<16x1xf32>
    %25 = arith.mulf %9, %9 : vector<16x50xf32>
    %cst_16 = arith.constant dense<0.000000e+00> : vector<16xf32>
    %26 = vector.multi_reduction <add>, %25, %cst_16 [1] : vector<16x50xf32> to vector<16xf32>
    %27 = vector.shape_cast %26 : vector<16xf32> to vector<16x1xf32>
    %28 = arith.addf %24, %27 : vector<16x1xf32>
    %29 = arith.mulf %12, %12 : vector<16x50xf32>
    %cst_17 = arith.constant dense<0.000000e+00> : vector<16xf32>
    %30 = vector.multi_reduction <add>, %29, %cst_17 [1] : vector<16x50xf32> to vector<16xf32>
    %31 = vector.shape_cast %30 : vector<16xf32> to vector<16x1xf32>
    %32 = arith.addf %28, %31 : vector<16x1xf32>
    %cst_18 = arith.constant 5.000000e-03 : f32
    %33 = vector.broadcast %cst_18 : f32 to vector<16x1xf32>
    %34 = arith.mulf %17, %33 : vector<16x1xf32>
    %cst_19 = arith.constant 5.000000e-03 : f32
    %35 = vector.broadcast %cst_19 : f32 to vector<16x1xf32>
    %36 = arith.mulf %32, %35 : vector<16x1xf32>
    %37 = arith.mulf %34, %34 : vector<16x1xf32>
    %38 = arith.subf %36, %37 : vector<16x1xf32>
    %cst_20 = arith.constant 0.000000e+00 : f32
    %39 = vector.broadcast %cst_20 : f32 to vector<16x1xf32>
    %40 = arith.maximumf %38, %39 : vector<16x1xf32>
    %c0_21 = arith.constant 0 : index
    %c0_22 = arith.constant 0 : index
    %41 = vector.load %arg2[%c0_21, %c0_22] : memref<16x1xf32, #tpu.memory_space<vmem>>, vector<16x1xf32>
    %cst_23 = arith.constant 9.99999974E-6 : f32
    %42 = vector.broadcast %cst_23 : f32 to vector<16x1xf32>
    %43 = arith.addf %40, %42 : vector<16x1xf32>
    %44 = math.rsqrt %43 : vector<16x1xf32>
    %45 = arith.mulf %41, %44 : vector<16x1xf32>
    %c0_24 = arith.constant 0 : index
    %c0_25 = arith.constant 0 : index
    %46 = vector.load %arg3[%c0_24, %c0_25] : memref<16x1xf32, #tpu.memory_space<vmem>>, vector<16x1xf32>
    %47 = arith.mulf %34, %45 : vector<16x1xf32>
    %48 = arith.subf %46, %47 : vector<16x1xf32>
    %49 = vector.broadcast %45 : vector<16x1xf32> to vector<16x50xf32>
    %50 = arith.mulf %3, %49 : vector<16x50xf32>
    %51 = vector.broadcast %48 : vector<16x1xf32> to vector<16x50xf32>
    %52 = arith.addf %50, %51 : vector<16x50xf32>
    %cst_26 = arith.constant 0.000000e+00 : f32
    %53 = vector.broadcast %cst_26 : f32 to vector<16x50xf32>
    %54 = arith.maximumf %52, %53 : vector<16x50xf32>
    %55 = vector.broadcast %45 : vector<16x1xf32> to vector<16x50xf32>
    %56 = arith.mulf %6, %55 : vector<16x50xf32>
    %57 = vector.broadcast %48 : vector<16x1xf32> to vector<16x50xf32>
    %58 = arith.addf %56, %57 : vector<16x50xf32>
    %cst_27 = arith.constant 0.000000e+00 : f32
    %59 = vector.broadcast %cst_27 : f32 to vector<16x50xf32>
    %60 = arith.maximumf %58, %59 : vector<16x50xf32>
    %61 = vector.broadcast %45 : vector<16x1xf32> to vector<16x50xf32>
    %62 = arith.mulf %9, %61 : vector<16x50xf32>
    %63 = vector.broadcast %48 : vector<16x1xf32> to vector<16x50xf32>
    %64 = arith.addf %62, %63 : vector<16x50xf32>
    %cst_28 = arith.constant 0.000000e+00 : f32
    %65 = vector.broadcast %cst_28 : f32 to vector<16x50xf32>
    %66 = arith.maximumf %64, %65 : vector<16x50xf32>
    %67 = vector.broadcast %45 : vector<16x1xf32> to vector<16x50xf32>
    %68 = arith.mulf %12, %67 : vector<16x50xf32>
    %69 = vector.broadcast %48 : vector<16x1xf32> to vector<16x50xf32>
    %70 = arith.addf %68, %69 : vector<16x50xf32>
    %cst_29 = arith.constant 0.000000e+00 : f32
    %71 = vector.broadcast %cst_29 : f32 to vector<16x50xf32>
    %72 = arith.maximumf %70, %71 : vector<16x50xf32>
    %73 = arith.maximumf %54, %60 : vector<16x50xf32>
    %74 = arith.maximumf %66, %72 : vector<16x50xf32>
    %75 = arith.maximumf %73, %74 : vector<16x50xf32>
    %76 = arith.truncf %75 : vector<16x50xf32> to vector<16x50xbf16>
    %c0_30 = arith.constant 0 : index
    %c0_31 = arith.constant 0 : index
    %77 = vector.load %arg4[%c0_30, %c0_31] : memref<16x50xbf16, #tpu.memory_space<vmem>>, vector<16x50xbf16>
    tpu.vector_store %arg4[%c0_30, %c0_31], %76 {strides = array<i32>} : memref<16x50xbf16, #tpu.memory_space<vmem>>, vector<16x50xbf16>,
    return
  }
}

module attributes {stable_mosaic.version = 11 : i64} {
  func.func @_mlp_kernel(%arg0: memref<2x400xbf16, #tpu.memory_space<vmem>>, %arg1: memref<400x120xbf16, #tpu.memory_space<vmem>>, %arg2: memref<1x120xf32, #tpu.memory_space<vmem>>, %arg3: memref<120x84xbf16, #tpu.memory_space<vmem>>, %arg4: memref<1x84xf32, #tpu.memory_space<vmem>>, %arg5: memref<84x10xbf16, #tpu.memory_space<vmem>>, %arg6: memref<1x10xf32, #tpu.memory_space<vmem>>, %arg7: memref<2x10xf32, #tpu.memory_space<vmem>>) attributes {dimension_semantics = [], scalar_prefetch = 0 : i64, scratch_operands = 0 : i64, tpu.core_type = #tpu.core_type<tc>} {
    %c0 = arith.constant 0 : index
    %c0_0 = arith.constant 0 : index
    %0 = vector.load %arg0[%c0, %c0_0] : memref<2x400xbf16, #tpu.memory_space<vmem>>, vector<2x400xbf16>
    %c0_1 = arith.constant 0 : index
    %c0_2 = arith.constant 0 : index
    %1 = vector.load %arg1[%c0_1, %c0_2] : memref<400x120xbf16, #tpu.memory_space<vmem>>, vector<400x120xbf16>
    %cst = arith.constant dense<0.000000e+00> : vector<2x120xf32>
    %2 = tpu.matmul %0, %1, %cst {dimension_numbers = #tpu.dot_dimension_numbers<[1], [0], [0], [1], [0, 0, 1, 1], [], []>} : vector<2x400xbf16>, vector<400x120xbf16>, vector<2x120xf32> -> vector<2x120xf32>
    %c0_3 = arith.constant 0 : index
    %c0_4 = arith.constant 0 : index
    %3 = vector.load %arg2[%c0_3, %c0_4] : memref<1x120xf32, #tpu.memory_space<vmem>>, vector<1x120xf32>
    %4 = vector.broadcast %3 : vector<1x120xf32> to vector<2x120xf32>
    %5 = arith.addf %2, %4 : vector<2x120xf32>
    %cst_5 = arith.constant 0.000000e+00 : f32
    %6 = vector.broadcast %cst_5 : f32 to vector<2x120xf32>
    %7 = arith.maximumf %5, %6 : vector<2x120xf32>
    %8 = arith.truncf %7 : vector<2x120xf32> to vector<2x120xbf16>
    %c0_6 = arith.constant 0 : index
    %c0_7 = arith.constant 0 : index
    %9 = vector.load %arg3[%c0_6, %c0_7] : memref<120x84xbf16, #tpu.memory_space<vmem>>, vector<120x84xbf16>
    %cst_8 = arith.constant dense<0.000000e+00> : vector<2x84xf32>
    %10 = tpu.matmul %8, %9, %cst_8 {dimension_numbers = #tpu.dot_dimension_numbers<[1], [0], [0], [1], [0, 0, 1, 1], [], []>} : vector<2x120xbf16>, vector<120x84xbf16>, vector<2x84xf32> -> vector<2x84xf32>
    %c0_9 = arith.constant 0 : index
    %c0_10 = arith.constant 0 : index
    %11 = vector.load %arg4[%c0_9, %c0_10] : memref<1x84xf32, #tpu.memory_space<vmem>>, vector<1x84xf32>
    %12 = vector.broadcast %11 : vector<1x84xf32> to vector<2x84xf32>
    %13 = arith.addf %10, %12 : vector<2x84xf32>
    %cst_11 = arith.constant 0.000000e+00 : f32
    %14 = vector.broadcast %cst_11 : f32 to vector<2x84xf32>
    %15 = arith.maximumf %13, %14 : vector<2x84xf32>
    %16 = arith.truncf %15 : vector<2x84xf32> to vector<2x84xbf16>
    %c0_12 = arith.constant 0 : index
    %c0_13 = arith.constant 0 : index
    %17 = vector.load %arg5[%c0_12, %c0_13] : memref<84x10xbf16, #tpu.memory_space<vmem>>, vector<84x10xbf16>
    %cst_14 = arith.constant dense<0.000000e+00> : vector<2x10xf32>
    %18 = tpu.matmul %16, %17, %cst_14 {dimension_numbers = #tpu.dot_dimension_numbers<[1], [0], [0], [1], [0, 0, 1, 1], [], []>} : vector<2x84xbf16>, vector<84x10xbf16>, vector<2x10xf32> -> vector<2x10xf32>
    %c0_15 = arith.constant 0 : index
    %c0_16 = arith.constant 0 : index
    %19 = vector.load %arg6[%c0_15, %c0_16] : memref<1x10xf32, #tpu.memory_space<vmem>>, vector<1x10xf32>
    %20 = vector.broadcast %19 : vector<1x10xf32> to vector<2x10xf32>
    %21 = arith.addf %18, %20 : vector<2x10xf32>
    %c0_17 = arith.constant 0 : index
    %c0_18 = arith.constant 0 : index
    %22 = vector.load %arg7[%c0_17, %c0_18] : memref<2x10xf32, #tpu.memory_space<vmem>>, vector<2x10xf32>
    tpu.vector_store %arg7[%c0_17, %c0_18], %21 {strides = array<i32>} : memref<2x10xf32, #tpu.memory_space<vmem>>, vector<2x10xf32>,
    return
  }
}

</mosaic_0001>

<bundles_post_ra>
// kernel: lenet_forward.3
= control target key start
LH: loop header
LB: loop body
LE: loop exit
PB: predicated region body
PF: predicated region fallthrough
CT: control target
= control target key end

     0   :  { %vm139_vm0 = vcmask 1044480   ;;  %vm140_vm1 = vcmask 1045504   ;;  %v1332_v1 = vmov 0   ;;  %v1333_v2 = vmov 65535   ;;  %s1779_s0 = inlined_call_operand.vmem [shape: bf16[4,75,392], index: 0, kind: input, shape index: {}]   ;;  %s1780_s1 = inlined_call_operand.vmem [shape: bf16[6,75], index: 1, kind: input, shape index: {}]   ;;  %s1781_s2 = inlined_call_operand.vmem [shape: f32[6,1], index: 2, kind: input, shape index: {}]   ;;  %s1782_s3 = inlined_call_operand.vmem [shape: f32[6,1], index: 3, kind: input, shape index: {}]   ;;  %s1783_s4 = inlined_call_operand.vmem [shape: bf16[6,392], index: 4, kind: output, shape index: {}]  }
   0x1   :  { %v1210_v0 = vld [vmem:[%s1779_s0 + $0x84] ss:$16 sps:$4 sm:$0x3f]   ;;  %187 = vmatprep.mubr.bf16.mxu0 %v1332_v1  ;;  %228 = vmatprep.mubr.bf16.mxu1 %v1332_v1  ;;  %v141_v3 = vsel %vm139_vm0, 4294967295, %v1333_v2  ;;  %v1218_v11 = vld [vmem:[%s1779_s0 + $0x6c] ss:$16 sps:$4 sm:$0xff]  }
   0x2   :  { %1208 = vset.pattern.permute.xlu1 %v1332_v1  ;;  %1209 = vset.pattern.permute.xlu0 %v1332_v1  ;;  %v1367_v4 = vsel %vm140_vm1, %v141_v3, 0  ;;  %v1212_v5 = vld [vmem:[%s1779_s0 + $0x8c] ss:$16 sps:$4 sm:$0x3f]   ;;  %v1216_v10 = vld [vmem:[%s1779_s0 + $0x64] ss:$16 sps:$4 sm:$0xff]  }
   0x3   :  { %v147_v6 = vand.u32 %v1210_v0, %v1367_v4  ;;  %v1214_v7 = vld [vmem:[%s1779_s0 + $0x80] ss:$16 sps:$4 sm:$0x3f]   ;;  %v1215_v8 = vld [vmem:[%s1779_s0 + $0x88] ss:$16 sps:$4 sm:$0x3f]   ;;  %v153_v9 = vand.u32 %v1212_v5, %v1367_v4 }
   0x4   :  { %v144_v12 = vand.u32 %v1214_v7, %v1367_v4  ;;  %v150_v13 = vand.u32 %v1215_v8, %v1367_v4  ;;  %v1220_v14 = vld [vmem:[%s1779_s0 + $0x60] ss:$16 sps:$4 sm:$0xff]   ;;  %v1221_v15 = vld [vmem:[%s1779_s0 + $0x68] ss:$16 sps:$4 sm:$0xff]   ;;  %v1222_v16 = vld [vmem:[%s1779_s0 + $0x44] ss:$16 sps:$4 sm:$0xff]  }
   0x5   :  { %161 = vmatprep.subr.bf16.mxu0 %v147_v6  ;;  %202 = vmatprep.subr.bf16.mxu1 %v153_v9  ;;  %v1224_v17 = vld [vmem:[%s1779_s0 + $0x4c] ss:$16 sps:$4 sm:$0xff]   ;;  %v1226_v18 = vld [vmem:[%s1779_s0 + $0x40] ss:$16 sps:$4 sm:$0xff]   ;;  %v1227_v19 = vld [vmem:[%s1779_s0 + $0x48] ss:$16 sps:$4 sm:$0xff]  }
   0x6   :  { %162 = vmatpush1.bf16.msra.mxu0 %v144_v12  ;;  %203 = vmatpush1.bf16.msra.mxu1 %v150_v13  ;;  %v1228_v20 = vld [vmem:[%s1779_s0 + $0x24] ss:$16 sps:$4 sm:$0xff]   ;;  %v1230_v21 = vld [vmem:[%s1779_s0 + $0x2c] ss:$16 sps:$4 sm:$0xff]   ;;  %v1232_v22 = vld [vmem:[%s1779_s0 + $0x20] ss:$16 sps:$4 sm:$0xff]  }
   0x7   :  { %163 = vmatprep.subr.bf16.mxu0 %v1216_v10  ;;  %204 = vmatprep.subr.bf16.mxu1 %v1218_v11  ;;  %v1233_v23 = vld [vmem:[%s1779_s0 + $0x28] ss:$16 sps:$4 sm:$0xff]   ;;  %v1234_v24 = vld [vmem:[%s1779_s0 + $0x4] ss:$16 sps:$4 sm:$0xff]   ;;  %v1236_v25 = vld [vmem:[%s1779_s0 + $0xc] ss:$16 sps:$4 sm:$0xff]  }
   0x8   :  { %v1242_v26 = vld [vmem:[%s1779_s0 + $0x124] ss:$16 sps:$4 sm:$0x3f]   ;;  %v1245_v27 = vld [vmem:[%s1779_s0 + $0x12c] ss:$16 sps:$4 sm:$0x3f]  }
   0x9   :  { %v1238_v28 = vld [vmem:[%s1779_s0] ss:$16 sps:$4 sm:$0xff]   ;;  %v1239_v30 = vld [vmem:[%s1779_s0 + $0x8] ss:$16 sps:$4 sm:$0xff]   ;;  %v358_v32 = vand.u32 %v1242_v26, %v1367_v4  ;;  %v364_v33 = vand.u32 %v1245_v27, %v1367_v4  ;;  %vm135_vm2 = vcmask 613376   ;;  %vm887_vm3 = vcmask 62464  }
   0xa   :  { %164 = vmatpush1.bf16.msra.mxu0 %v1220_v14  ;;  %205 = vmatpush1.bf16.msra.mxu1 %v1221_v15  ;;  %v1240_v29 = vld [vmem:[%s1779_s0 + $0x120] ss:$16 sps:$4 sm:$0x3f]   ;;  %v1243_v31 = vld [vmem:[%s1779_s0 + $0x128] ss:$16 sps:$4 sm:$0x3f]  }
   0xb   :  { %165 = vmatprep.subr.bf16.mxu0 %v1222_v16  ;;  %206 = vmatprep.subr.bf16.mxu1 %v1224_v17  ;;  %v1447_v34 = vld [vmem:[%s1780_s1] sm:$0x7]  ;;  %v355_v35 = vand.u32 %v1240_v29, %v1367_v4  ;;  %v361_v36 = vand.u32 %v1243_v31, %v1367_v4  ;;  %v1248_v37 = vld [vmem:[%s1779_s0 + $0x104] ss:$16 sps:$4 sm:$0xff]   ;;  %v1251_v38 = vld [vmem:[%s1779_s0 + $0x10c] ss:$16 sps:$4 sm:$0xff]  }
   0xc   :  { %v1246_v39 = vld [vmem:[%s1779_s0 + $0x100] ss:$16 sps:$4 sm:$0xff]   ;;  %v1249_v40 = vld [vmem:[%s1779_s0 + $0x108] ss:$16 sps:$4 sm:$0xff]   ;;  %v1254_v41 = vld [vmem:[%s1779_s0 + $0xe4] ss:$16 sps:$4 sm:$0xff]  }
   0xd   :  { %v1257_v42 = vld [vmem:[%s1779_s0 + $0xec] ss:$16 sps:$4 sm:$0xff]   ;;  %v1252_v43 = vld [vmem:[%s1779_s0 + $0xe0] ss:$16 sps:$4 sm:$0xff]   ;;  %v1255_v44 = vld [vmem:[%s1779_s0 + $0xe8] ss:$16 sps:$4 sm:$0xff]  }
   0xe   :  { %166 = vmatpush1.bf16.msra.mxu0 %v1226_v18  ;;  %207 = vmatpush1.bf16.msra.mxu1 %v1227_v19  ;;  %v1260_v45 = vld [vmem:[%s1779_s0 + $0xc4] ss:$16 sps:$4 sm:$0xff]   ;;  %v1263_v46 = vld [vmem:[%s1779_s0 + $0xcc] ss:$16 sps:$4 sm:$0xff]   ;;  %v1258_v47 = vld [vmem:[%s1779_s0 + $0xc0] ss:$16 sps:$4 sm:$0xff]  }
   0xf   :  { %167 = vmatprep.subr.bf16.mxu0 %v1228_v20  ;;  %208 = vmatprep.subr.bf16.mxu1 %v1230_v21  ;;  %v1261_v48 = vld [vmem:[%s1779_s0 + $0xc8] ss:$16 sps:$4 sm:$0xff]   ;;  %v1266_v49 = vld [vmem:[%s1779_s0 + $0xa4] ss:$16 sps:$4 sm:$0xff]   ;;  %v1269_v50 = vld [vmem:[%s1779_s0 + $0xac] ss:$16 sps:$4 sm:$0xff]  }
  0x10   :  { %v1272_v51 = vld [vmem:[%s1779_s0 + $0x1c4] ss:$16 sps:$4 sm:$0x3f]   ;;  %v1275_v52 = vld [vmem:[%s1779_s0 + $0x1cc] ss:$16 sps:$4 sm:$0x3f]  }
  0x11   :  { %v1264_v53 = vld [vmem:[%s1779_s0 + $0xa0] ss:$16 sps:$4 sm:$0xff]   ;;  %v1267_v55 = vld [vmem:[%s1779_s0 + $0xa8] ss:$16 sps:$4 sm:$0xff]   ;;  %v569_v57 = vand.u32 %v1272_v51, %v1367_v4  ;;  %v575_v58 = vand.u32 %v1275_v52, %v1367_v4  ;;  %v1278_v61 = vld [vmem:[%s1779_s0 + $0x1a4] ss:$16 sps:$4 sm:$0xff]  }
  0x12   :  { %168 = vmatpush1.bf16.msra.mxu0 %v1232_v22  ;;  %209 = vmatpush1.bf16.msra.mxu1 %v1233_v23  ;;  %v1270_v54 = vld [vmem:[%s1779_s0 + $0x1c0] ss:$16 sps:$4 sm:$0x3f]   ;;  %v1273_v56 = vld [vmem:[%s1779_s0 + $0x1c8] ss:$16 sps:$4 sm:$0x3f]  }
  0x13   :  { %169 = vmatprep.subr.bf16.mxu0 %v1234_v24  ;;  %210 = vmatprep.subr.bf16.mxu1 %v1236_v25  ;;  %v566_v59 = vand.u32 %v1270_v54, %v1367_v4  ;;  %v572_v60 = vand.u32 %v1273_v56, %v1367_v4  ;;  %v1281_v62 = vld [vmem:[%s1779_s0 + $0x1ac] ss:$16 sps:$4 sm:$0xff]   ;;  %v1276_v63 = vld [vmem:[%s1779_s0 + $0x1a0] ss:$16 sps:$4 sm:$0xff]   ;;  %v1279_v0 = vld [vmem:[%s1779_s0 + $0x1a8] ss:$16 sps:$4 sm:$0xff]  }
  0x14   :  { %v1284_v2 = vld [vmem:[%s1779_s0 + $0x184] ss:$16 sps:$4 sm:$0xff]   ;;  %v1287_v3 = vld [vmem:[%s1779_s0 + $0x18c] ss:$16 sps:$4 sm:$0xff]   ;;  %v1282_v5 = vld [vmem:[%s1779_s0 + $0x180] ss:$16 sps:$4 sm:$0xff]  }
  0x15   :  { %v1285_v6 = vld [vmem:[%s1779_s0 + $0x188] ss:$16 sps:$4 sm:$0xff]   ;;  %v1290_v7 = vld [vmem:[%s1779_s0 + $0x164] ss:$16 sps:$4 sm:$0xff]   ;;  %v1293_v8 = vld [vmem:[%s1779_s0 + $0x16c] ss:$16 sps:$4 sm:$0xff]  }
  0x16   :  { %170 = vmatpush1.bf16.msra.mxu0 %v1238_v28  ;;  %211 = vmatpush1.bf16.msra.mxu1 %v1239_v30  ;;  %v1288_v9 = vld [vmem:[%s1779_s0 + $0x160] ss:$16 sps:$4 sm:$0xff]   ;;  %v1291_v10 = vld [vmem:[%s1779_s0 + $0x168] ss:$16 sps:$4 sm:$0xff]   ;;  %v1296_v11 = vld [vmem:[%s1779_s0 + $0x144] ss:$16 sps:$4 sm:$0xff]  }
  0x17   :  { %372 = vmatprep.subr.bf16.mxu0 %v358_v32  ;;  %413 = vmatprep.subr.bf16.mxu1 %v364_v33  ;;  %v1299_v12 = vld [vmem:[%s1779_s0 + $0x14c] ss:$16 sps:$4 sm:$0xff]   ;;  %v1302_v13 = vld [vmem:[%s1779_s0 + $0x264] ss:$16 sps:$4 sm:$0x3f]   ;;  %vm1046_vm4 = vcmask 1042432  }
  0x18   :  { %v1305_v14 = vld [vmem:[%s1779_s0 + $0x26c] ss:$16 sps:$4 sm:$0x3f]   ;;  %v1294_v15 = vld [vmem:[%s1779_s0 + $0x140] ss:$16 sps:$4 sm:$0xff]   ;;  %v780_v19 = vand.u32 %v1302_v13, %v1367_v4  ;;  %vm1047_vm5 = vcmask 63492  }
  0x19   :  { %1074 = vmatmul.mubr.msk.bf16.vlgmr.msra.gmra.mxu0 %vm135_vm2, %v1447_v34  ;;  %1075 = vmatmul.mubr.msk.bf16.vlgmr.msra.gmra.mxu1 %vm135_vm2, %v1447_v34  ;;  %v1297_v16 = vld [vmem:[%s1779_s0 + $0x148] ss:$16 sps:$4 sm:$0xff]   ;;  %v1300_v17 = vld [vmem:[%s1779_s0 + $0x260] ss:$16 sps:$4 sm:$0x3f]   ;;  %v786_v20 = vand.u32 %v1305_v14, %v1367_v4  ;;  %vm1048_vm6 = vmor %vm1047_vm5, %vm1046_vm4 }
  0x1a   :  { %373 = vmatpush1.bf16.msra.mxu0 %v355_v35  ;;  %414 = vmatpush1.bf16.msra.mxu1 %v361_v36  ;;  %v1303_v18 = vld [vmem:[%s1779_s0 + $0x268] ss:$16 sps:$4 sm:$0x3f]   ;;  %v777_v21 = vand.u32 %v1300_v17, %v1367_v4  ;;  %v1308_v23 = vld [vmem:[%s1779_s0 + $0x244] ss:$16 sps:$4 sm:$0xff]  }
  0x1b   :  { %374 = vmatprep.subr.bf16.mxu0 %v1248_v37  ;;  %415 = vmatprep.subr.bf16.mxu1 %v1251_v38  ;;  %v783_v22 = vand.u32 %v1303_v18, %v1367_v4  ;;  %v1311_v24 = vld [vmem:[%s1779_s0 + $0x24c] ss:$16 sps:$4 sm:$0xff]   ;;  %v1306_v4 = vld [vmem:[%s1779_s0 + $0x240] ss:$16 sps:$4 sm:$0xff]   ;;  %v1309_v25 = vld [vmem:[%s1779_s0 + $0x248] ss:$16 sps:$4 sm:$0xff]  }
  0x1c   :  { %398 = vmatprep.mubr.bf16.mxu0 %v1332_v1  ;;  %439 = vmatprep.mubr.bf16.mxu1 %v1332_v1  ;;  %v1314_v26 = vld [vmem:[%s1779_s0 + $0x224] ss:$16 sps:$4 sm:$0xff]   ;;  %v1317_v27 = vld [vmem:[%s1779_s0 + $0x22c] ss:$16 sps:$4 sm:$0xff]   ;;  %v1312_v28 = vld [vmem:[%s1779_s0 + $0x220] ss:$16 sps:$4 sm:$0xff]  }
  0x1d   :  { %v1315_v29 = vld [vmem:[%s1779_s0 + $0x228] ss:$16 sps:$4 sm:$0xff]   ;;  %v1320_v30 = vld [vmem:[%s1779_s0 + $0x204] ss:$16 sps:$4 sm:$0xff]   ;;  %v1318_v31 = vld [vmem:[%s1779_s0 + $0x200] ss:$16 sps:$4 sm:$0xff]  }
  0x1e   :  { %375 = vmatpush1.bf16.msra.mxu0 %v1246_v39  ;;  %416 = vmatpush1.bf16.msra.mxu1 %v1249_v40  ;;  %v1321_v32 = vld [vmem:[%s1779_s0 + $0x208] ss:$16 sps:$4 sm:$0xff]   ;;  %v1326_v33 = vld [vmem:[%s1779_s0 + $0x1e4] ss:$16 sps:$4 sm:$0xff]   ;;  %v1329_v35 = vld [vmem:[%s1779_s0 + $0x1ec] ss:$16 sps:$4 sm:$0xff]  }
  0x1f   :  { %376 = vmatprep.subr.bf16.mxu0 %v1254_v41  ;;  %417 = vmatprep.subr.bf16.mxu1 %v1257_v42  ;;  %v1324_v36 = vld [vmem:[%s1779_s0 + $0x1e0] ss:$16 sps:$4 sm:$0xff]   ;;  %v1327_v37 = vld [vmem:[%s1779_s0 + $0x1e8] ss:$16 sps:$4 sm:$0xff]  }
  0x22   :  { %377 = vmatpush1.bf16.msra.mxu0 %v1252_v43  ;;  %418 = vmatpush1.bf16.msra.mxu1 %v1255_v44 }
  0x23   :  { %378 = vmatprep.subr.bf16.mxu0 %v1260_v45  ;;  %419 = vmatprep.subr.bf16.mxu1 %v1263_v46 }
  0x26   :  { %379 = vmatpush1.bf16.msra.mxu0 %v1258_v47  ;;  %420 = vmatpush1.bf16.msra.mxu1 %v1261_v48 }
  0x27   :  { %380 = vmatprep.subr.bf16.mxu0 %v1266_v49  ;;  %421 = vmatprep.subr.bf16.mxu1 %v1269_v50 }
  0x2a   :  { %381 = vmatpush1.bf16.msra.mxu0 %v1264_v53  ;;  %422 = vmatpush1.bf16.msra.mxu1 %v1267_v55 }
  0x2b   :  { %583 = vmatprep.subr.bf16.mxu0 %v569_v57  ;;  %624 = vmatprep.subr.bf16.mxu1 %v575_v58 }
  0x2d   :  { %1116 = vmatmul.mubr.msk.bf16.vlgmr.msra.gmra.mxu0 %vm135_vm2, %v1447_v34  ;;  %1117 = vmatmul.mubr.msk.bf16.vlgmr.msra.gmra.mxu1 %vm135_vm2, %v1447_v34 }
  0x2e   :  { %584 = vmatpush1.bf16.msra.mxu0 %v566_v59  ;;  %625 = vmatpush1.bf16.msra.mxu1 %v572_v60 }
  0x2f   :  { %585 = vmatprep.subr.bf16.mxu0 %v1278_v61  ;;  %626 = vmatprep.subr.bf16.mxu1 %v1281_v62 }
  0x30   :  { %609 = vmatprep.mubr.bf16.mxu0 %v1332_v1  ;;  %650 = vmatprep.mubr.bf16.mxu1 %v1332_v1 }
  0x32   :  { %586 = vmatpush1.bf16.msra.mxu0 %v1276_v63  ;;  %627 = vmatpush1.bf16.msra.mxu1 %v1279_v0 }
  0x33   :  { %587 = vmatprep.subr.bf16.mxu0 %v1284_v2  ;;  %628 = vmatprep.subr.bf16.mxu1 %v1287_v3 }
  0x36   :  { %588 = vmatpush1.bf16.msra.mxu0 %v1282_v5  ;;  %629 = vmatpush1.bf16.msra.mxu1 %v1285_v6 }
  0x37   :  { %589 = vmatprep.subr.bf16.mxu0 %v1290_v7  ;;  %630 = vmatprep.subr.bf16.mxu1 %v1293_v8 }
  0x3a   :  { %590 = vmatpush1.bf16.msra.mxu0 %v1288_v9  ;;  %631 = vmatpush1.bf16.msra.mxu1 %v1291_v10 }
  0x3b   :  { %591 = vmatprep.subr.bf16.mxu0 %v1296_v11  ;;  %632 = vmatprep.subr.bf16.mxu1 %v1299_v12 }
  0x3e   :  { %592 = vmatpush1.bf16.msra.mxu0 %v1294_v15  ;;  %633 = vmatpush1.bf16.msra.mxu1 %v1297_v16 }
  0x3f   :  { %794 = vmatprep.subr.bf16.mxu0 %v780_v19  ;;  %835 = vmatprep.subr.bf16.mxu1 %v786_v20 }
  0x41   :  { %1158 = vmatmul.mubr.msk.bf16.vlgmr.msra.gmra.mxu0 %vm135_vm2, %v1447_v34  ;;  %1159 = vmatmul.mubr.msk.bf16.vlgmr.msra.gmra.mxu1 %vm135_vm2, %v1447_v34 }
  0x42   :  { %795 = vmatpush1.bf16.msra.mxu0 %v777_v21  ;;  %836 = vmatpush1.bf16.msra.mxu1 %v783_v22 }
  0x43   :  { %796 = vmatprep.subr.bf16.mxu0 %v1308_v23  ;;  %837 = vmatprep.subr.bf16.mxu1 %v1311_v24 }
  0x44   :  { %820 = vmatprep.mubr.bf16.mxu0 %v1332_v1  ;;  %861 = vmatprep.mubr.bf16.mxu1 %v1332_v1  ;;  %v1323_v1 = vld [vmem:[%s1779_s0 + $0x20c] ss:$16 sps:$4 sm:$0xff]  }
  0x46   :  { %797 = vmatpush1.bf16.msra.mxu0 %v1306_v4  ;;  %838 = vmatpush1.bf16.msra.mxu1 %v1309_v25 }
  0x47   :  { %798 = vmatprep.subr.bf16.mxu0 %v1314_v26  ;;  %839 = vmatprep.subr.bf16.mxu1 %v1317_v27 }
  0x4a   :  { %799 = vmatpush1.bf16.msra.mxu0 %v1312_v28  ;;  %840 = vmatpush1.bf16.msra.mxu1 %v1315_v29 }
  0x4b   :  { %800 = vmatprep.subr.bf16.mxu0 %v1320_v30  ;;  %841 = vmatprep.subr.bf16.mxu1 %v1323_v1 }
  0x4e   :  { %801 = vmatpush1.bf16.msra.mxu0 %v1318_v31  ;;  %842 = vmatpush1.bf16.msra.mxu1 %v1321_v32 }
  0x4f   :  { %802 = vmatprep.subr.bf16.mxu0 %v1326_v33  ;;  %843 = vmatprep.subr.bf16.mxu1 %v1329_v35 }
  0x52   :  { %803 = vmatpush1.bf16.msra.mxu0 %v1324_v36  ;;  %844 = vmatpush1.bf16.msra.mxu1 %v1327_v37 }
  0x55   :  { %1200 = vmatmul.mubr.msk.bf16.vlgmr.msra.gmra.mxu0 %vm135_vm2, %v1447_v34  ;;  %1201 = vmatmul.mubr.msk.bf16.vlgmr.msra.gmra.mxu1 %vm135_vm2, %v1447_v34 }
  0xd9   :  { %v1649_v38 = vpop.f32.mrf.mxu0  ;;  %v1651_v39 = vpop.f32.mrf.mxu1 }
  0xda   :  { %v892_v40 = vmul.f32 %v1649_v38, %v1649_v38  ;;  %v894_v41 = vmul.f32 %v1651_v39, %v1651_v39 }
  0xdb   :  { %v1657_v42 = vpop.f32.mrf.mxu0  ;;  %v1659_v43 = vpop.f32.mrf.mxu1 }
  0xdc   :  { %v893_v44 = vmul.f32 %v1657_v42, %v1657_v42  ;;  %v895_v34 = vmul.f32 %v1659_v43, %v1659_v43  ;;  %v896_v45 = vsel %vm140_vm1, %v892_v40, 0.0  ;;  %v899_v49 = vsel %vm140_vm1, %v894_v41, 0.0 }
  0xdd   :  { %v193_v46 = vpop.f32.mrf.mxu0  ;;  %v234_v47 = vpop.f32.mrf.mxu1 }
  0xde   :  { %v897_v48 = vsel %vm140_vm1, %v893_v44, 0.0  ;;  %v901_v53 = vsel %vm887_vm3, %v895_v34, 0.0 }
  0xdf   :  { %v194_v50 = vpop.f32.mrf.mxu0  ;;  %v235_v51 = vpop.f32.mrf.mxu1  ;;  %v898_v52 = vadd.f32 %v897_v48, %v896_v45 }
  0xe1   :  { %v900_v54 = vadd.f32 %v899_v49, %v898_v52 }
  0xe3   :  { %v902_v55 = vadd.f32 %v901_v53, %v900_v54 }
  0xe5   :  { %903 = vadd.xlane.f32.xlu0 %v902_v55 }
  0xed   :  { %v1669_v56 = vpop.f32.mrf.mxu0  ;;  %v1671_v57 = vpop.f32.mrf.mxu1 }
  0xee   :  { %v905_v58 = vmul.f32 %v1669_v56, %v1669_v56  ;;  %v907_v59 = vmul.f32 %v1671_v57, %v1671_v57  ;;  %v870_v1 = vadd.f32 %v1669_v56, %v1649_v38  ;;  %v872_v31 = vadd.f32 %v1671_v57, %v1651_v39 }
  0xef   :  { %v1677_v60 = vpop.f32.mrf.mxu0  ;;  %v1679_v61 = vpop.f32.mrf.mxu1 }
  0xf0   :  { %v909_v62 = vsel %vm140_vm1, %v905_v58, 0.0  ;;  %v906_v63 = vmul.f32 %v1677_v60, %v1677_v60  ;;  %v908_v0 = vmul.f32 %v1679_v61, %v1679_v61  ;;  %v912_v6 = vsel %vm140_vm1, %v907_v59, 0.0 }
  0xf1   :  { %v404_v2 = vpop.f32.mrf.mxu0  ;;  %v445_v3 = vpop.f32.mrf.mxu1  ;;  %v871_v32 = vadd.f32 %v1677_v60, %v1657_v42  ;;  %v873_v35 = vadd.f32 %v1679_v61, %v1659_v43 }
  0xf2   :  { %v910_v5 = vsel %vm140_vm1, %v906_v63, 0.0  ;;  %v914_v10 = vsel %vm887_vm3, %v908_v0, 0.0 }
  0xf3   :  { %v405_v7 = vpop.f32.mrf.mxu0  ;;  %v446_v8 = vpop.f32.mrf.mxu1  ;;  %v911_v9 = vadd.f32 %v910_v5, %v909_v62 }
  0xf5   :  { %v913_v11 = vadd.f32 %v912_v6, %v911_v9 }
  0xf7   :  { %v915_v12 = vadd.f32 %v914_v10, %v913_v11 }
  0xf9   :  { %916 = vadd.xlane.f32.xlu0 %v915_v12 }
 0x101   :  { %v1689_v13 = vpop.f32.mrf.mxu0  ;;  %v1691_v14 = vpop.f32.mrf.mxu1 }
 0x102   :  { %v919_v15 = vmul.f32 %v1689_v13, %v1689_v13  ;;  %v921_v16 = vmul.f32 %v1691_v14, %v1691_v14  ;;  %v874_v33 = vadd.f32 %v870_v1, %v1689_v13  ;;  %v876_v36 = vadd.f32 %v872_v31, %v1691_v14  ;;  %v952_v1 = vld [vmem:[%s1781_s2] sm:$0x3f] }
 0x103   :  { %v1697_v17 = vpop.f32.mrf.mxu0  ;;  %v1699_v18 = vpop.f32.mrf.mxu1 }
 0x104   :  { %v920_v19 = vmul.f32 %v1697_v17, %v1697_v17  ;;  %v922_v20 = vmul.f32 %v1699_v18, %v1699_v18  ;;  %v923_v23 = vsel %vm140_vm1, %v919_v15, 0.0  ;;  %v926_v4 = vsel %vm140_vm1, %v921_v16, 0.0 }
 0x105   :  { %v615_v21 = vpop.f32.mrf.mxu0  ;;  %v656_v22 = vpop.f32.mrf.mxu1  ;;  %v875_v41 = vadd.f32 %v871_v32, %v1697_v17  ;;  %v877_v46 = vadd.f32 %v873_v35, %v1699_v18 }
 0x106   :  { %v924_v24 = vsel %vm140_vm1, %v920_v19, 0.0  ;;  %v928_v28 = vsel %vm887_vm3, %v922_v20, 0.0 }
 0x107   :  { %v616_v25 = vpop.f32.mrf.mxu0  ;;  %v657_v26 = vpop.f32.mrf.mxu1  ;;  %v925_v27 = vadd.f32 %v924_v24, %v923_v23 }
 0x109   :  { %v927_v29 = vadd.f32 %v926_v4, %v925_v27 }
 0x10b   :  { %v929_v30 = vadd.f32 %v928_v28, %v927_v29 }
 0x10d   :  { %930 = vadd.xlane.f32.xlu1 %v929_v30 }
 0x115   :  { %v1719_v37 = vpop.f32.mrf.mxu0  ;;  %v1721_v40 = vpop.f32.mrf.mxu1 }
 0x116   :  { %v878_v44 = vadd.f32 %v874_v33, %v1719_v37  ;;  %v933_v34 = vmul.f32 %v1719_v37, %v1719_v37  ;;  %v935_v45 = vmul.f32 %v1721_v40, %v1721_v40  ;;  %v880_v49 = vadd.f32 %v876_v36, %v1721_v40  ;;  %v956_v33 = vld [vmem:[%s1782_s3] sm:$0x3f] }
 0x117   :  { %v1730_v47 = vpop.f32.mrf.mxu0  ;;  %v1732_v48 = vpop.f32.mrf.mxu1 }
 0x118   :  { %v879_v50 = vadd.f32 %v875_v41, %v1730_v47  ;;  %v934_v51 = vmul.f32 %v1730_v47, %v1730_v47  ;;  %v882_v52 = vsel %vm140_vm1, %v878_v44, 0.0  ;;  %v937_v53 = vsel %vm140_vm1, %v933_v34, 0.0 }
 0x119   :  { %v881_v54 = vadd.f32 %v877_v46, %v1732_v48  ;;  %v826_v55 = vpop.f32.mrf.mxu0  ;;  %v867_v58 = vpop.f32.mrf.mxu1  ;;  %v936_v63 = vmul.f32 %v1732_v48, %v1732_v48  ;;  %v940_v0 = vsel %vm140_vm1, %v935_v45, 0.0  ;;  %v885_v7 = vsel %vm140_vm1, %v880_v49, 0.0 }
 0x11a   :  { %v883_v59 = vsel %vm140_vm1, %v879_v50, 0.0  ;;  %v938_v62 = vsel %vm140_vm1, %v934_v51, 0.0 }
 0x11b   :  { %v827_v2 = vpop.f32.mrf.mxu0  ;;  %v868_v3 = vpop.f32.mrf.mxu1  ;;  %v939_v5 = vadd.f32 %v938_v62, %v937_v53  ;;  %v884_v6 = vadd.f32 %v883_v59, %v882_v52  ;;  %v942_v10 = vsel %vm887_vm3, %v936_v63, 0.0  ;;  %v888_v11 = vsel %vm887_vm3, %v881_v54, 0.0 }
 0x11d   :  { %v941_v8 = vadd.f32 %v940_v0, %v939_v5  ;;  %v886_v9 = vadd.f32 %v885_v7, %v884_v6 }
 0x11f   :  { %v943_v12 = vadd.f32 %v942_v10, %v941_v8  ;;  %v889_v15 = vadd.f32 %v888_v11, %v886_v9 }
 0x121   :  { %944 = vadd.xlane.f32.xlu0 %v943_v12  ;;  %890 = vadd.xlane.f32.xlu1 %v889_v15 }
 0x16e   :  { %v904_v16 = vpop.xlane.xlu0 %903 }
 0x182   :  { %v917_v19 = vpop.xlane.xlu0 %916 }
 0x183   :  { %v918_v21 = vadd.f32 %v917_v19, %v904_v16 }
 0x196   :  { %v931_v20 = vpop.xlane.xlu1 %930 }
 0x197   :  { %v932_v22 = vadd.f32 %v931_v20, %v918_v21 }
 0x1aa   :  { %v945_v23 = vpop.xlane.xlu0 %944  ;;  %v891_v24 = vpop.xlane.xlu1 %890 }
 0x1ab   :  { %v946_v4 = vadd.f32 %v945_v23, %v932_v22  ;;  %v947_v25 = vmul.f32 0.0006377551, %v891_v24 }
 0x1ad   :  { %v948_v26 = vmul.f32 0.0006377551, %v946_v4  ;;  %v949_v27 = vmul.f32 %v947_v25, %v947_v25 }
 0x1af   :  { %v950_v28 = vsub.f32 %v948_v26, %v949_v27 }
 0x1b1   :  { %v951_v29 = vmax.f32 %v950_v28, 0.0 }
 0x1b3   :  { %v953_v30 = vadd.f32 1e-05, %v951_v29 }
 0x1b5   :  { %1330 = vrsqrt.f32 %v953_v30 }
 0x1c2   :  { %v1331_v31 = vpop.eup %1330 }
 0x1c3   :  { %v955_v32 = vmul.f32 %v1331_v31, %v952_v1 }
 0x1c5   :  { %v957_v35 = vmul.f32 %v955_v32, %v947_v25  ;;  %961 = vperm.xlu1 %1208, %v955_v32  }
 0x1c7   :  { %v958_v36 = vsub.f32 %v956_v33, %v957_v35 }
 0x1c9   :  { %970 = vperm.xlu0 %1209, %v958_v36  }
 0x240   :  { %v962_v41 = vpop.permute.xlu1 %961 }
 0x241   :  { %v964_v44 = vmul.f32 %v962_v41, %v1649_v38  ;;  %v965_v34 = vmul.f32 %v962_v41, %v1657_v42  ;;  %v966_v45 = vmul.f32 %v962_v41, %v1651_v39  ;;  %v967_v46 = vmul.f32 %v962_v41, %v1659_v43 }
 0x242   :  { %v981_v49 = vmul.f32 %v962_v41, %v1669_v56  ;;  %v982_v50 = vmul.f32 %v962_v41, %v1677_v60  ;;  %v983_v51 = vmul.f32 %v962_v41, %v1671_v57  ;;  %v984_v52 = vmul.f32 %v962_v41, %v1679_v61 }
 0x243   :  { %v993_v53 = vmul.f32 %v962_v41, %v1689_v13  ;;  %v994_v54 = vmul.f32 %v962_v41, %v1697_v17  ;;  %v995_v38 = vmul.f32 %v962_v41, %v1691_v14  ;;  %v996_v42 = vmul.f32 %v962_v41, %v1699_v18 }
 0x244   :  { %v1005_v39 = vmul.f32 %v962_v41, %v1719_v37  ;;  %v1006_v43 = vmul.f32 %v962_v41, %v1730_v47  ;;  %v1007_v56 = vmul.f32 %v962_v41, %v1721_v40  ;;  %v1008_v60 = vmul.f32 %v962_v41, %v1732_v48  ;;  %v971_v55 = vpop.permute.xlu0 %970 }
 0x245   :  { %v973_v57 = vadd.f32 %v971_v55, %v964_v44  ;;  %v974_v58 = vadd.f32 %v971_v55, %v965_v34  ;;  %v975_v61 = vadd.f32 %v971_v55, %v966_v45  ;;  %v976_v59 = vadd.f32 %v971_v55, %v967_v46 }
 0x246   :  { %v985_v13 = vadd.f32 %v981_v49, %v971_v55  ;;  %v986_v17 = vadd.f32 %v982_v50, %v971_v55  ;;  %v987_v14 = vadd.f32 %v983_v51, %v971_v55  ;;  %v988_v62 = vadd.f32 %v984_v52, %v971_v55 }
 0x247   :  { %v977_v18 = vmax.f32 %v973_v57, 0.0  ;;  %v978_v63 = vmax.f32 %v974_v58, 0.0  ;;  %v979_v37 = vmax.f32 %v975_v61, 0.0  ;;  %v980_v0 = vmax.f32 %v976_v59, 0.0 }
 0x248   :  { %v989_v47 = vmax.f32 %v985_v13, 0.0  ;;  %v990_v2 = vmax.f32 %v986_v17, 0.0  ;;  %v991_v40 = vmax.f32 %v987_v14, 0.0  ;;  %v992_v3 = vmax.f32 %v988_v62, 0.0 }
 0x249   :  { %v997_v48 = vadd.f32 %v993_v53, %v971_v55  ;;  %v998_v5 = vadd.f32 %v994_v54, %v971_v55  ;;  %v999_v6 = vadd.f32 %v995_v38, %v971_v55  ;;  %v1000_v7 = vadd.f32 %v996_v42, %v971_v55 }
 0x24a   :  { %v1009_v8 = vadd.f32 %v1005_v39, %v971_v55  ;;  %v1010_v9 = vadd.f32 %v1006_v43, %v971_v55  ;;  %v1011_v10 = vadd.f32 %v1007_v56, %v971_v55  ;;  %v1012_v11 = vadd.f32 %v1008_v60, %v971_v55 }
 0x24b   :  { %v1001_v12 = vmax.f32 %v997_v48, 0.0  ;;  %v1002_v15 = vmax.f32 %v998_v5, 0.0  ;;  %v1003_v16 = vmax.f32 %v999_v6, 0.0  ;;  %v1004_v19 = vmax.f32 %v1000_v7, 0.0 }
 0x24c   :  { %v1013_v20 = vmax.f32 %v1009_v8, 0.0  ;;  %v1014_v21 = vmax.f32 %v1010_v9, 0.0  ;;  %v1015_v22 = vmax.f32 %v1011_v10, 0.0  ;;  %v1016_v23 = vmax.f32 %v1012_v11, 0.0 }
 0x24d   :  { %v1017_v24 = vmax.f32 %v977_v18, %v989_v47  ;;  %v1018_v4 = vmax.f32 %v978_v63, %v990_v2  ;;  %v1019_v25 = vmax.f32 %v979_v37, %v991_v40  ;;  %v1020_v26 = vmax.f32 %v980_v0, %v992_v3 }
 0x24e   :  { %v1021_v27 = vmax.f32 %v1001_v12, %v1013_v20  ;;  %v1022_v28 = vmax.f32 %v1002_v15, %v1014_v21  ;;  %v1023_v29 = vmax.f32 %v1003_v16, %v1015_v22  ;;  %v1024_v30 = vmax.f32 %v1004_v19, %v1016_v23 }
 0x250   :  { %v1025_v1 = vmax.f32 %v1017_v24, %v1021_v27  ;;  %v1026_v31 = vmax.f32 %v1018_v4, %v1022_v28  ;;  %v1027_v32 = vmax.f32 %v1019_v25, %v1023_v29  ;;  %v1028_v33 = vmax.f32 %v1020_v26, %v1024_v30 }
 0x252   :  { %v1204_v35 = vpack.c.bf16 %v1026_v31, %v1025_v1  ;;  %v1205_v36 = vpack.c.bf16 %v1028_v33, %v1027_v32 }
 0x254   :  { %1045 = vst [vmem:[%s1783_s4] sm:$0x77] %v1204_v35  ;;  %1049 = vst.msk [vmem:[%s1783_s4 + $0x8] sm:$0x77] %vm1048_vm6, %v1205_v36 }

// kernel: lenet_forward.4
= control target key start
LH: loop header
LB: loop body
LE: loop exit
PB: predicated region body
PF: predicated region fallthrough
CT: control target
= control target key end

     0   :  { %v814_v0 = vmov 0   ;;  %vm105_vm0 = vcmask 179200   ;;  %vm109_vm1 = vcmask 1042432   ;;  %vm523_vm2 = vcmask 408576   ;;  %s1098_s0 = inlined_call_operand.vmem [shape: bf16[4,150,50], index: 0, kind: input, shape index: {}]   ;;  %s1099_s1 = inlined_call_operand.vmem [shape: bf16[16,150], index: 1, kind: input, shape index: {}]   ;;  %s1100_s2 = inlined_call_operand.vmem [shape: f32[16,1], index: 2, kind: input, shape index: {}]   ;;  %s1101_s3 = inlined_call_operand.vmem [shape: f32[16,1], index: 3, kind: input, shape index: {}]   ;;  %s1102_s4 = inlined_call_operand.vmem [shape: bf16[16,50], index: 4, kind: output, shape index: {}]  }
   0x1   :  { %113 = vmatprep.subr.bf16.mxu0 %v814_v0  ;;  %234 = vmatprep.subr.bf16.mxu1 %v814_v0  ;;  %v767_v1 = vld [vmem:[%s1098_s0 + $0x38] sm:$0xff]   ;;  %v768_v2 = vld [vmem:[%s1098_s0 + $0x84] sm:$0xff]   ;;  %v769_v3 = vld [vmem:[%s1098_s0 + $0x30] sm:$0xff]   ;;  %vm650_vm3 = vcmask 404480  }
   0x2   :  { %765 = vset.pattern.permute.xlu0 %v814_v0  ;;  %766 = vset.pattern.permute.xlu1 %v814_v0  ;;  %v770_v4 = vld [vmem:[%s1098_s0 + $0x7c] sm:$0xff]   ;;  %v771_v5 = vld [vmem:[%s1098_s0 + $0x28] sm:$0xff]   ;;  %v772_v6 = vld [vmem:[%s1098_s0 + $0x74] sm:$0xff]  }
   0x3   :  { %114 = vmatpush1.bf16.msra.mxu0 %v767_v1  ;;  %235 = vmatpush1.bf16.msra.mxu1 %v768_v2  ;;  %v773_v7 = vld [vmem:[%s1098_s0 + $0x20] sm:$0xff]   ;;  %v774_v8 = vld [vmem:[%s1098_s0 + $0x6c] sm:$0xff]   ;;  %v775_v9 = vld [vmem:[%s1098_s0 + $0x18] sm:$0xff]  }
   0x4   :  { %115 = vmatprep.subr.bf16.mxu0 %v814_v0  ;;  %236 = vmatprep.subr.bf16.mxu1 %v814_v0  ;;  %v776_v10 = vld [vmem:[%s1098_s0 + $0x64] sm:$0xff]   ;;  %v777_v11 = vld [vmem:[%s1098_s0 + $0x10] sm:$0xff]   ;;  %v778_v12 = vld [vmem:[%s1098_s0 + $0x5c] sm:$0xff]  }
   0x5   :  { %v787_v13 = vld [vmem:[%s1099_s1 + $0x4] ss:$8 sps:$4 sm:$0xff]   ;;  %v780_v15 = vld [vmem:[%s1098_s0 + $0x54] sm:$0xff]   ;;  %v783_v16 = vld [vmem:[%s1098_s0 + $0x48] ss:$0 sps:$4 sm:$0x77]  }
   0x6   :  { %v779_v14 = vld [vmem:[%s1098_s0 + $0x8] sm:$0xff]   ;;  %669 = vmatprep.mubr.msk.bf16.mxu0 %vm105_vm0, %v787_v13  ;;  %699 = vmatprep.mubr.msk.bf16.mxu1 %vm105_vm0, %v787_v13  ;;  %v781_v17 = vld [vmem:[%s1098_s0] sm:$0xff]   ;;  %v784_v18 = vld [vmem:[%s1098_s0 + $0x94] ss:$0 sps:$4 sm:$0x77]   ;;  %v111_v20 = vsel %vm109_vm1, %v783_v16, 0 }
   0x7   :  { %116 = vmatpush1.bf16.msra.mxu0 %v769_v3  ;;  %237 = vmatpush1.bf16.msra.mxu1 %v770_v4  ;;  %v782_v19 = vld [vmem:[%s1098_s0 + $0x4c] sm:$0xff]   ;;  %v232_v21 = vsel %vm109_vm1, %v784_v18, 0  ;;  %v785_v22 = vld [vmem:[%s1098_s0 + $0x40] sm:$0xff]   ;;  %v793_v28 = vld [vmem:[%s1098_s0 + $0x114] sm:$0xff]  }
   0x8   :  { %117 = vmatprep.subr.bf16.mxu0 %v814_v0  ;;  %238 = vmatprep.subr.bf16.mxu1 %v814_v0  ;;  %v786_v23 = vld [vmem:[%s1098_s0 + $0x8c] sm:$0xff]   ;;  %v932_v24 = vld [vmem:[%s1099_s1] ss:$8 sps:$4 sm:$0xff]   ;;  %v796_v31 = vld [vmem:[%s1098_s0 + $0xb8] sm:$0xff]  }
   0x9   :  { %v790_v25 = vld [vmem:[%s1098_s0 + $0xd0] sm:$0xff]   ;;  %v791_v26 = vld [vmem:[%s1098_s0 + $0x11c] sm:$0xff]   ;;  %v792_v27 = vld [vmem:[%s1098_s0 + $0xc8] sm:$0xff]  }
   0xa   :  { %v794_v29 = vld [vmem:[%s1098_s0 + $0xc0] sm:$0xff]   ;;  %v795_v30 = vld [vmem:[%s1098_s0 + $0x10c] sm:$0xff]   ;;  %v801_v36 = vld [vmem:[%s1098_s0 + $0xf4] sm:$0xff]  }
   0xb   :  { %118 = vmatpush1.bf16.msra.mxu0 %v771_v5  ;;  %239 = vmatpush1.bf16.msra.mxu1 %v772_v6  ;;  %v797_v32 = vld [vmem:[%s1098_s0 + $0x104] sm:$0xff]   ;;  %v798_v33 = vld [vmem:[%s1098_s0 + $0xb0] sm:$0xff]   ;;  %v799_v34 = vld [vmem:[%s1098_s0 + $0xfc] sm:$0xff]  }
   0xc   :  { %119 = vmatprep.subr.bf16.mxu0 %v814_v0  ;;  %240 = vmatprep.subr.bf16.mxu1 %v814_v0  ;;  %v800_v35 = vld [vmem:[%s1098_s0 + $0xa8] sm:$0xff]   ;;  %v802_v37 = vld [vmem:[%s1098_s0 + $0xa0] sm:$0xff]   ;;  %v804_v39 = vld [vmem:[%s1098_s0 + $0x98] sm:$0xff]  }
   0xd   :  { %v803_v38 = vld [vmem:[%s1098_s0 + $0xec] sm:$0xff]   ;;  %v805_v40 = vld [vmem:[%s1098_s0 + $0xe4] sm:$0xff]   ;;  %v806_v41 = vld [vmem:[%s1098_s0 + $0xe0] ss:$0 sps:$4 sm:$0x77]  }
   0xe   :  { %v807_v42 = vld [vmem:[%s1098_s0 + $0x12c] ss:$0 sps:$4 sm:$0x77]   ;;  %v353_v43 = vsel %vm109_vm1, %v806_v41, 0  ;;  %v808_v45 = vld [vmem:[%s1098_s0 + $0xd8] sm:$0xff]   ;;  %v809_v46 = vld [vmem:[%s1098_s0 + $0x124] sm:$0xff]  }
   0xf   :  { %120 = vmatpush1.bf16.msra.mxu0 %v773_v7  ;;  %241 = vmatpush1.bf16.msra.mxu1 %v774_v8  ;;  %v474_v44 = vsel %vm109_vm1, %v807_v42, 0 }
  0x10   :  { %121 = vmatprep.subr.bf16.mxu0 %v814_v0  ;;  %242 = vmatprep.subr.bf16.mxu1 %v814_v0 }
  0x13   :  { %122 = vmatpush1.bf16.msra.mxu0 %v775_v9  ;;  %243 = vmatpush1.bf16.msra.mxu1 %v776_v10 }
  0x14   :  { %123 = vmatprep.subr.bf16.mxu0 %v814_v0  ;;  %244 = vmatprep.subr.bf16.mxu1 %v814_v0 }
  0x17   :  { %124 = vmatpush1.bf16.msra.mxu0 %v777_v11  ;;  %245 = vmatpush1.bf16.msra.mxu1 %v778_v12 }
  0x18   :  { %125 = vmatprep.subr.bf16.mxu0 %v814_v0  ;;  %246 = vmatprep.subr.bf16.mxu1 %v814_v0 }
  0x1b   :  { %126 = vmatpush1.bf16.msra.mxu0 %v779_v14  ;;  %247 = vmatpush1.bf16.msra.mxu1 %v780_v15 }
  0x1c   :  { %127 = vmatprep.subr.bf16.mxu0 %v814_v0  ;;  %248 = vmatprep.subr.bf16.mxu1 %v814_v0 }
  0x1f   :  { %128 = vmatpush1.bf16.msra.mxu0 %v781_v17  ;;  %249 = vmatpush1.bf16.msra.mxu1 %v782_v19 }
  0x20   :  { %141 = vmatprep.subr.bf16.mxu0 %v814_v0  ;;  %262 = vmatprep.subr.bf16.mxu1 %v814_v0 }
  0x23   :  { %142 = vmatpush2.bf16.msra.mxu0 %v111_v20  ;;  %263 = vmatpush2.bf16.msra.mxu1 %v232_v21 }
  0x24   :  { %143 = vmatprep.subr.bf16.mxu0 %v814_v0  ;;  %264 = vmatprep.subr.bf16.mxu1 %v814_v0 }
  0x27   :  { %144 = vmatpush2.bf16.msra.mxu0 %v785_v22  ;;  %265 = vmatpush2.bf16.msra.mxu1 %v786_v23 }
  0x28   :  { %355 = vmatprep.subr.bf16.mxu0 %v814_v0  ;;  %476 = vmatprep.subr.bf16.mxu1 %v814_v0 }
  0x2a   :  { %146 = vmatmul.mubr.bf16.vlgmr.msra.gmra.mxu0 %v932_v24  ;;  %267 = vmatmul.mubr.bf16.vlgmr.msra.gmra.mxu1 %v932_v24 }
  0x2b   :  { %356 = vmatpush1.bf16.msra.mxu0 %v790_v25  ;;  %477 = vmatpush1.bf16.msra.mxu1 %v791_v26 }
  0x2c   :  { %357 = vmatprep.subr.bf16.mxu0 %v814_v0  ;;  %478 = vmatprep.subr.bf16.mxu1 %v814_v0 }
  0x2d   :  { %729 = vmatprep.mubr.msk.bf16.mxu0 %vm105_vm0, %v787_v13  ;;  %759 = vmatprep.mubr.msk.bf16.mxu1 %vm105_vm0, %v787_v13 }
  0x2f   :  { %358 = vmatpush1.bf16.msra.mxu0 %v792_v27  ;;  %479 = vmatpush1.bf16.msra.mxu1 %v793_v28 }
  0x30   :  { %359 = vmatprep.subr.bf16.mxu0 %v814_v0  ;;  %480 = vmatprep.subr.bf16.mxu1 %v814_v0 }
  0x33   :  { %360 = vmatpush1.bf16.msra.mxu0 %v794_v29  ;;  %481 = vmatpush1.bf16.msra.mxu1 %v795_v30 }
  0x34   :  { %361 = vmatprep.subr.bf16.mxu0 %v814_v0  ;;  %482 = vmatprep.subr.bf16.mxu1 %v814_v0 }
  0x37   :  { %362 = vmatpush1.bf16.msra.mxu0 %v796_v31  ;;  %483 = vmatpush1.bf16.msra.mxu1 %v797_v32 }
  0x38   :  { %363 = vmatprep.subr.bf16.mxu0 %v814_v0  ;;  %484 = vmatprep.subr.bf16.mxu1 %v814_v0 }
  0x3b   :  { %364 = vmatpush1.bf16.msra.mxu0 %v798_v33  ;;  %485 = vmatpush1.bf16.msra.mxu1 %v799_v34 }
  0x3c   :  { %365 = vmatprep.subr.bf16.mxu0 %v814_v0  ;;  %486 = vmatprep.subr.bf16.mxu1 %v814_v0 }
  0x3f   :  { %366 = vmatpush1.bf16.msra.mxu0 %v800_v35  ;;  %487 = vmatpush1.bf16.msra.mxu1 %v801_v36 }
  0x40   :  { %367 = vmatprep.subr.bf16.mxu0 %v814_v0  ;;  %488 = vmatprep.subr.bf16.mxu1 %v814_v0 }
  0x43   :  { %368 = vmatpush1.bf16.msra.mxu0 %v802_v37  ;;  %489 = vmatpush1.bf16.msra.mxu1 %v803_v38 }
  0x44   :  { %369 = vmatprep.subr.bf16.mxu0 %v814_v0  ;;  %490 = vmatprep.subr.bf16.mxu1 %v814_v0 }
  0x47   :  { %370 = vmatpush1.bf16.msra.mxu0 %v804_v39  ;;  %491 = vmatpush1.bf16.msra.mxu1 %v805_v40 }
  0x48   :  { %383 = vmatprep.subr.bf16.mxu0 %v814_v0  ;;  %504 = vmatprep.subr.bf16.mxu1 %v814_v0 }
  0x4b   :  { %384 = vmatpush2.bf16.msra.mxu0 %v353_v43  ;;  %505 = vmatpush2.bf16.msra.mxu1 %v474_v44 }
  0x4c   :  { %385 = vmatprep.subr.bf16.mxu0 %v814_v0  ;;  %506 = vmatprep.subr.bf16.mxu1 %v814_v0 }
  0x4f   :  { %386 = vmatpush2.bf16.msra.mxu0 %v808_v45  ;;  %507 = vmatpush2.bf16.msra.mxu1 %v809_v46 }
  0x52   :  { %388 = vmatmul.mubr.bf16.vlgmr.msra.gmra.mxu0 %v932_v24  ;;  %509 = vmatmul.mubr.bf16.vlgmr.msra.gmra.mxu1 %v932_v24 }
  0xea   :  { %v1022_v47 = vpop.f32.mrf.mxu0  ;;  %v1024_v48 = vpop.f32.mrf.mxu1 }
  0xeb   :  { %v530_v49 = vmul.f32 %v1022_v47, %v1022_v47  ;;  %v538_v51 = vmul.f32 %v1024_v48, %v1024_v48  ;;  %v517_v63 = vadd.f32 %v1024_v48, %v1022_v47 }
  0xec   :  { %v149_v50 = vpop.f32.mrf.mxu0  ;;  %v270_v52 = vpop.f32.mrf.mxu1 }
  0xed   :  { %v532_v53 = vsel %vm523_vm2, %v530_v49, 0.0  ;;  %v540_v54 = vsel %vm523_vm2, %v538_v51, 0.0 }
  0xee   :  { %533 = vadd.xlane.f32.xlu0 %v532_v53  ;;  %v1032_v55 = vpop.f32.mrf.mxu0  ;;  %541 = vadd.xlane.f32.xlu1 %v540_v54  ;;  %v1034_v56 = vpop.f32.mrf.mxu1  ;;  %v578_v53 = vld [vmem:[%s1100_s2] sm:$0xff] }
  0xef   :  { %v531_v57 = vmul.f32 %v1032_v55, %v1032_v55  ;;  %v539_v59 = vmul.f32 %v1034_v56, %v1034_v56  ;;  %v518_v5 = vadd.f32 %v1034_v56, %v1032_v55 }
  0xf0   :  { %v152_v58 = vpop.f32.mrf.mxu0  ;;  %v273_v60 = vpop.f32.mrf.mxu1 }
  0xf1   :  { %v535_v61 = vsel %vm523_vm2, %v531_v57, 0.0  ;;  %v543_v62 = vsel %vm523_vm2, %v539_v59, 0.0  ;;  %v579_v58 = vld [vmem:[%s1100_s2 + $0x8] sm:$0xff] }
  0xf2   :  { %536 = vadd.xlane.f32.xlu0 %v535_v61  ;;  %544 = vadd.xlane.f32.xlu1 %v543_v62  ;;  %v586_v62 = vld [vmem:[%s1101_s3] sm:$0xff] }
 0x112   :  { %v1044_v0 = vpop.f32.mrf.mxu0  ;;  %v1047_v2 = vpop.f32.mrf.mxu1 }
 0x113   :  { %v519_v1 = vadd.f32 %v517_v63, %v1044_v0  ;;  %v548_v3 = vmul.f32 %v1044_v0, %v1044_v0  ;;  %v558_v17 = vmul.f32 %v1047_v2, %v1047_v2 }
 0x114   :  { %v391_v4 = vpop.f32.mrf.mxu0  ;;  %v512_v6 = vpop.f32.mrf.mxu1 }
 0x115   :  { %v550_v7 = vsel %vm523_vm2, %v548_v3, 0.0  ;;  %v521_v8 = vadd.f32 %v519_v1, %v1047_v2  ;;  %v560_v19 = vsel %vm523_vm2, %v558_v17, 0.0  ;;  %v587_v3 = vld [vmem:[%s1101_s3 + $0x8] sm:$0xff] }
 0x116   :  { %551 = vadd.xlane.f32.xlu0 %v550_v7  ;;  %v1055_v9 = vpop.f32.mrf.mxu0  ;;  %v1057_v10 = vpop.f32.mrf.mxu1 }
 0x117   :  { %v520_v11 = vadd.f32 %v518_v5, %v1055_v9  ;;  %v549_v12 = vmul.f32 %v1055_v9, %v1055_v9  ;;  %v524_v15 = vsel %vm523_vm2, %v521_v8, 0.0  ;;  %v559_v21 = vmul.f32 %v1057_v10, %v1057_v10 }
 0x118   :  { %v394_v13 = vpop.f32.mrf.mxu0  ;;  %v515_v14 = vpop.f32.mrf.mxu1 }
 0x119   :  { %v553_v16 = vsel %vm523_vm2, %v549_v12, 0.0  ;;  %v522_v18 = vadd.f32 %v520_v11, %v1057_v10  ;;  %v563_v22 = vsel %vm523_vm2, %v559_v21, 0.0 }
 0x11a   :  { %525 = vadd.xlane.f32.xlu0 %v524_v15  ;;  %554 = vadd.xlane.f32.xlu1 %v553_v16 }
 0x11b   :  { %v527_v20 = vsel %vm523_vm2, %v522_v18, 0.0 }
 0x11e   :  { %561 = vadd.xlane.f32.xlu0 %v560_v19  ;;  %528 = vadd.xlane.f32.xlu1 %v527_v20 }
 0x122   :  { %564 = vadd.xlane.f32.xlu1 %v563_v22 }
 0x177   :  { %v534_v23 = vpop.xlane.xlu0 %533  ;;  %v542_v24 = vpop.xlane.xlu1 %541 }
 0x178   :  { %v546_v30 = vadd.f32 %v542_v24, %v534_v23 }
 0x17b   :  { %v537_v25 = vpop.xlane.xlu0 %536  ;;  %v545_v26 = vpop.xlane.xlu1 %544 }
 0x17c   :  { %v547_v35 = vadd.f32 %v545_v26, %v537_v25 }
 0x19f   :  { %v552_v27 = vpop.xlane.xlu0 %551 }
 0x1a0   :  { %v556_v31 = vadd.f32 %v552_v27, %v546_v30 }
 0x1a3   :  { %v526_v28 = vpop.xlane.xlu0 %525  ;;  %v555_v29 = vpop.xlane.xlu1 %554 }
 0x1a4   :  { %v568_v32 = vmul.f32 0.005, %v526_v28  ;;  %v557_v38 = vadd.f32 %v555_v29, %v547_v35 }
 0x1a6   :  { %v572_v37 = vmul.f32 %v568_v32, %v568_v32 }
 0x1a7   :  { %v562_v33 = vpop.xlane.xlu0 %561  ;;  %v529_v34 = vpop.xlane.xlu1 %528 }
 0x1a8   :  { %v566_v36 = vadd.f32 %v562_v33, %v556_v31  ;;  %v569_v40 = vmul.f32 0.005, %v529_v34 }
 0x1aa   :  { %v570_v39 = vmul.f32 0.005, %v566_v36  ;;  %v573_v45 = vmul.f32 %v569_v40, %v569_v40 }
 0x1ab   :  { %v565_v41 = vpop.xlane.xlu1 %564 }
 0x1ac   :  { %v574_v42 = vsub.f32 %v570_v39, %v572_v37  ;;  %v567_v43 = vadd.f32 %v565_v41, %v557_v38 }
 0x1ae   :  { %v576_v44 = vmax.f32 %v574_v42, 0.0  ;;  %v571_v46 = vmul.f32 0.005, %v567_v43 }
 0x1b0   :  { %v580_v49 = vadd.f32 1e-05, %v576_v44  ;;  %v575_v50 = vsub.f32 %v571_v46, %v573_v45 }
 0x1b2   :  { %810 = vrsqrt.f32 %v580_v49  ;;  %v577_v51 = vmax.f32 %v575_v50, 0.0 }
 0x1b4   :  { %v581_v52 = vadd.f32 1e-05, %v577_v51 }
 0x1b6   :  { %812 = vrsqrt.f32 %v581_v52 }
 0x1bf   :  { %v811_v54 = vpop.eup %810 }
 0x1c0   :  { %v584_v57 = vmul.f32 %v811_v54, %v578_v53 }
 0x1c2   :  { %594 = vperm.xlu0 %765, %v584_v57   ;;  %v588_v61 = vmul.f32 %v584_v57, %v568_v32 }
 0x1c3   :  { %v813_v59 = vpop.eup %812 }
 0x1c4   :  { %v585_v60 = vmul.f32 %v813_v59, %v579_v58  ;;  %v590_v63 = vsub.f32 %v586_v62, %v588_v61 }
 0x1c6   :  { %599 = vperm.xlu1 %766, %v585_v60   ;;  %v589_v1 = vmul.f32 %v585_v60, %v569_v40 }
 0x1c8   :  { %v591_v4 = vsub.f32 %v587_v3, %v589_v1 }
 0x1ca   :  { %606 = vperm.xlu1 %766, %v590_v63  }
 0x1ce   :  { %611 = vperm.xlu1 %766, %v591_v4  }
 0x23d   :  { %v595_v5 = vpop.permute.xlu0 %594 }
 0x23e   :  { %v602_v7 = vmul.f32 %v595_v5, %v1022_v47  ;;  %v618_v8 = vmul.f32 %v595_v5, %v1024_v48  ;;  %v624_v11 = vmul.f32 %v595_v5, %v1044_v0  ;;  %v630_v12 = vmul.f32 %v595_v5, %v1047_v2 }
 0x241   :  { %v600_v6 = vpop.permute.xlu1 %599 }
 0x242   :  { %v603_v18 = vmul.f32 %v600_v6, %v1032_v55  ;;  %v619_v19 = vmul.f32 %v600_v6, %v1034_v56  ;;  %v625_v47 = vmul.f32 %v600_v6, %v1055_v9  ;;  %v631_v48 = vmul.f32 %v600_v6, %v1057_v10 }
 0x245   :  { %v607_v13 = vpop.permute.xlu1 %606 }
 0x246   :  { %v614_v14 = vadd.f32 %v607_v13, %v602_v7  ;;  %v620_v15 = vadd.f32 %v618_v8, %v607_v13  ;;  %v626_v16 = vadd.f32 %v624_v11, %v607_v13  ;;  %v632_v17 = vadd.f32 %v630_v12, %v607_v13 }
 0x248   :  { %v616_v20 = vmax.f32 %v614_v14, 0.0  ;;  %v622_v21 = vmax.f32 %v620_v15, 0.0  ;;  %v628_v22 = vmax.f32 %v626_v16, 0.0  ;;  %v634_v23 = vmax.f32 %v632_v17, 0.0 }
 0x249   :  { %v612_v0 = vpop.permute.xlu1 %611 }
 0x24a   :  { %v636_v24 = vmax.f32 %v616_v20, %v622_v21  ;;  %v638_v2 = vmax.f32 %v628_v22, %v634_v23  ;;  %v615_v25 = vadd.f32 %v612_v0, %v603_v18  ;;  %v621_v26 = vadd.f32 %v619_v19, %v612_v0 }
 0x24b   :  { %v627_v27 = vadd.f32 %v625_v47, %v612_v0  ;;  %v633_v28 = vadd.f32 %v631_v48, %v612_v0 }
 0x24c   :  { %v640_v29 = vmax.f32 %v636_v24, %v638_v2  ;;  %v617_v30 = vmax.f32 %v615_v25, 0.0  ;;  %v623_v55 = vmax.f32 %v621_v26, 0.0 }
 0x24d   :  { %v629_v56 = vmax.f32 %v627_v27, 0.0  ;;  %v635_v31 = vmax.f32 %v633_v28, 0.0 }
 0x24e   :  { %v762_v32 = vpack.c.bf16 %v640_v29, %v640_v29  ;;  %v637_v33 = vmax.f32 %v617_v30, %v623_v55 }
 0x24f   :  { %v639_v34 = vmax.f32 %v629_v56, %v635_v31 }
 0x250   :  { %651 = vst.msk [vmem:[%s1102_s4] sm:$0xf] %vm650_vm3, %v762_v32 }
 0x251   :  { %v641_v9 = vmax.f32 %v637_v33, %v639_v34 }
 0x253   :  { %v763_v10 = vpack.c.bf16 %v641_v9, %v641_v9 }
 0x255   :  { %652 = vst.msk [vmem:[%s1102_s4 + $0x4] sm:$0xf] %vm650_vm3, %v763_v10 }

// kernel: lenet_forward.5
= control target key start
LH: loop header
LB: loop body
LE: loop exit
PB: predicated region body
PF: predicated region fallthrough
CT: control target
= control target key end

     0   :  { %v768_v1 = vmov 0   ;;  %v98_v20 = vlaneseq  ;;  %v769_v25 = vmov 1966171168   ;;  %vm421_vm0 = vcmask 1043456   ;;  %s970_s0 = inlined_call_operand.vmem [shape: bf16[2,400], index: 0, kind: input, shape index: {}]   ;;  %s971_s1 = inlined_call_operand.vmem [shape: bf16[400,120], index: 1, kind: input, shape index: {}]   ;;  %s972_s2 = inlined_call_operand.vmem [shape: f32[1,120], index: 2, kind: input, shape index: {}]   ;;  %s973_s3 = inlined_call_operand.vmem [shape: bf16[120,84], index: 3, kind: input, shape index: {}]   ;;  %s974_s4 = inlined_call_operand.vmem [shape: f32[1,84], index: 4, kind: input, shape index: {}]   ;;  %s975_s5 = inlined_call_operand.vmem [shape: bf16[84,10], index: 5, kind: input, shape index: {}]   ;;  %s976_s6 = inlined_call_operand.vmem [shape: f32[1,10], index: 6, kind: input, shape index: {}]   ;;  %s977_s7 = inlined_call_operand.hbm [shape: f32[2,10], index: 7, kind: output, shape index: {}]  }
   0x1   :  { %v707_v0 = vld [vmem:[%s971_s1 + $0x78] sm:$0xff]   ;;  %308 = vmatprep.subr.bf16.mxu1 %v768_v1  ;;  %v710_v4 = vld [vmem:[%s971_s1 + $0x70] sm:$0xff]   ;;  %v713_v7 = vld [vmem:[%s971_s1 + $0x68] sm:$0xff]   ;;  %v96_v26 = vunpack.c.l.s4 %v769_v25  ;;  %vm264_vm1 = vcmask 130048   ;;  %v770_v39 = vmov 0.0  }
   0x2   :  { %v708_v2 = vld [vmem:[%s971_s1 + $0xb8] sm:$0xff]   ;;  %628 = vmatprep.subr.bf16.mxu0 %v707_v0  ;;  %v711_v5 = vld [vmem:[%s971_s1 + $0xb0] sm:$0xff]   ;;  %v714_v8 = vld [vmem:[%s971_s1 + $0xa8] sm:$0xff]   ;;  %v99_v27 = vshrl.u32 %v98_v20, 7 }
   0x3   :  { %v709_v3 = vld [vmem:[%s971_s1 + $0x38] sm:$0xff]   ;;  %309 = vmatpush1.bf16.msra.mxu1 %v708_v2  ;;  %v712_v6 = vld [vmem:[%s971_s1 + $0x30] sm:$0xff]   ;;  %v715_v9 = vld [vmem:[%s971_s1 + $0x28] sm:$0xff]   ;;  %v97_v31 = vunpack.c.0.s8 %v96_v26 }
   0x4   :  { %629 = vmatpush3.bf16.msra.mxu0 %v709_v3  ;;  %310 = vmatprep.subr.bf16.mxu1 %v768_v1  ;;  %v716_v10 = vld [vmem:[%s971_s1 + $0x60] sm:$0xff]   ;;  %v719_v13 = vld [vmem:[%s971_s1 + $0x58] sm:$0xff]   ;;  %v722_v16 = vld [vmem:[%s971_s1 + $0x50] sm:$0xff]  }
   0x5   :  { %630 = vmatprep.subr.bf16.mxu0 %v710_v4  ;;  %v717_v11 = vld [vmem:[%s971_s1 + $0xa0] sm:$0xff]   ;;  %v720_v14 = vld [vmem:[%s971_s1 + $0x98] sm:$0xff]   ;;  %v723_v17 = vld [vmem:[%s971_s1 + $0x90] sm:$0xff]   ;;  %v100_v33 = vsub.s32 %v97_v31, %v99_v27 }
   0x6   :  { %v718_v12 = vld [vmem:[%s971_s1 + $0x20] sm:$0xff]   ;;  %v721_v15 = vld [vmem:[%s971_s1 + $0x18] sm:$0xff]   ;;  %v724_v18 = vld [vmem:[%s971_s1 + $0x10] sm:$0xff]  }
   0x7   :  { %311 = vmatpush1.bf16.msra.mxu1 %v711_v5  ;;  %v725_v19 = vld [vmem:[%s971_s1 + $0x48] sm:$0xff]   ;;  %v583_v23 = vld.sshfl [vmem:[%s970_s0] sm:$0x33 pattern:$0x75316420]  ;;  %v733_v41 = vld [vmem:[%s973_s3 + $0x30] sm:$0xff]  }
   0x8   :  { %631 = vmatpush3.bf16.msra.mxu0 %v712_v6  ;;  %312 = vmatprep.subr.bf16.mxu1 %v768_v1  ;;  %v726_v21 = vld [vmem:[%s971_s1 + $0x88] sm:$0xff]   ;;  %v728_v24 = vld [vmem:[%s971_s1 + $0x40] sm:$0xff]   ;;  %v732_v28 = vld [vmem:[%s973_s3 + $0x38] ss:$0 sps:$4 sm:$0xff]   ;;  %v94_v30 = vcombine.high %v583_v23, %v583_v23  ;;  %v101_v37 = vrot.slane %v583_v23, %v100_v33 }
   0x9   :  { %632 = vmatprep.subr.bf16.mxu0 %v713_v7  ;;  %v727_v22 = vld [vmem:[%s971_s1 + $0x8] sm:$0xff]   ;;  %v729_v29 = vld [vmem:[%s971_s1 + $0x80] sm:$0xff]   ;;  %v423_v35 = vsel %vm421_vm0, %v732_v28, 0 }
   0xa   :  { %v730_v32 = vld [vmem:[%s971_s1] sm:$0xff]   ;;  %v108_v36 = vrot.slane %v94_v30, %v100_v33  ;;  %v109_v40 = vcombine.high %v101_v37, %v101_v37 }
   0xb   :  { %313 = vmatpush1.bf16.msra.mxu1 %v714_v8  ;;  %v731_v34 = vld [vmem:[%s971_s1 + $0xc0] sm:$0xff]  }
   0xc   :  { %633 = vmatpush3.bf16.msra.mxu0 %v715_v9  ;;  %314 = vmatprep.subr.bf16.mxu1 %v768_v1  ;;  %v110_v38 = vcombine.high %v108_v36, %v108_v36 }
   0xd   :  { %634 = vmatprep.subr.bf16.mxu0 %v716_v10  ;;  %300 = vmatprep.mubr.bf16.mxu0 %v108_v36 }
   0xe   :  { %609 = vmatprep.mubr.msk.bf16.mxu1 %vm264_vm1, %v110_v38 }
   0xf   :  { %315 = vmatpush1.bf16.msra.mxu1 %v717_v11 }
  0x10   :  { %635 = vmatpush3.bf16.msra.mxu0 %v718_v12  ;;  %316 = vmatprep.subr.bf16.mxu1 %v768_v1 }
  0x11   :  { %636 = vmatprep.subr.bf16.mxu0 %v719_v13 }
  0x13   :  { %317 = vmatpush1.bf16.msra.mxu1 %v720_v14 }
  0x14   :  { %637 = vmatpush3.bf16.msra.mxu0 %v721_v15  ;;  %318 = vmatprep.subr.bf16.mxu1 %v768_v1 }
  0x15   :  { %638 = vmatprep.subr.bf16.mxu0 %v722_v16 }
  0x17   :  { %319 = vmatpush1.bf16.msra.mxu1 %v723_v17 }
  0x18   :  { %639 = vmatpush3.bf16.msra.mxu0 %v724_v18  ;;  %320 = vmatprep.subr.bf16.mxu1 %v768_v1 }
  0x19   :  { %640 = vmatprep.subr.bf16.mxu0 %v725_v19 }
  0x1b   :  { %321 = vmatpush1.bf16.msra.mxu1 %v726_v21 }
  0x1c   :  { %641 = vmatpush3.bf16.msra.mxu0 %v727_v22  ;;  %322 = vmatprep.subr.bf16.mxu1 %v768_v1 }
  0x1d   :  { %642 = vmatprep.subr.bf16.mxu0 %v728_v24 }
  0x1f   :  { %323 = vmatpush1.bf16.msra.mxu1 %v729_v29 }
  0x20   :  { %643 = vmatpush3.bf16.msra.mxu0 %v730_v32  ;;  %338 = vmatprep.subr.bf16.mxu1 %v768_v1 }
  0x21   :  { %666 = vmatprep.subr.bf16.mxu0 %v770_v39 }
  0x23   :  { %301 = vmatmul.mubr.bf16.vlgmr.msra.gmra.mxu0 %v101_v37  ;;  %339 = vmatpush2.bf16.msra.mxu1 %v731_v34 }
  0x24   :  { %667 = vmatpush3.bf16.msra.mxu0 %v423_v35 }
  0x25   :  { %12 = vsyncpa [#allocation3], 0  ;;  %668 = vmatprep.subr.bf16.mxu0 %v770_v39  ;;  %686 = vmatprep.subr.bf16.mxu1 %v770_v39  ;;  %v734_v42 = vld [vmem:[%s973_s3 + $0x28] sm:$0xff]   ;;  %v735_v43 = vld [vmem:[%s973_s3 + $0x20] sm:$0xff]   ;;  %vm771_vm2 = vmmov 0   ;;  %vm522_vm3 = vcmask 1041408  }
  0x26   :  { %341 = vmatmul.mubr.bf16.vlgmr.msra.gmra.mxu1 %v109_v40  ;;  %v736_v44 = vld [vmem:[%s973_s3 + $0x18] sm:$0xff]   ;;  %v737_v45 = vld [vmem:[%s973_s3 + $0x10] sm:$0xff]   ;;  %v738_v46 = vld [vmem:[%s973_s3 + $0x8] sm:$0xff]   ;;  %682 = vmatprep.mubr.msk.bf16.mxu0 %vm771_vm2, %v770_v39  ;;  %vm417_vm4 = vcmask 982016   ;;  %vm518_vm5 = vcmask 687104   ;;  %s772_s12 = smov [#allocation2]  }
  0x27   :  { %v739_v47 = vld [vmem:[%s973_s3] sm:$0xff]   ;;  %698 = vmatprep.mubr.msk.bf16.mxu1 %vm771_vm2, %v770_v39  ;;  %v740_v48 = vld [vmem:[%s975_s5 + $0x28] ss:$0 sps:$4 sm:$0x33]   ;;  %v742_v51 = vld [vmem:[%s975_s5 + $0x18] sm:$0xff]   ;;  %vm566_vm6 = vcmask 74752  }
  0x28   :  { %669 = vmatpush3.bf16.msra.mxu0 %v733_v41  ;;  %v524_v49 = vsel %vm522_vm3, %v740_v48, 0  ;;  %v741_v50 = vld [vmem:[%s975_s5 + $0x20] sm:$0xff]   ;;  %v743_v52 = vld [vmem:[%s975_s5 + $0x10] sm:$0xff]   ;;  %v744_v3 = vld [vmem:[%s975_s5 + $0x8] sm:$0xff]  }
  0x29   :  { %670 = vmatprep.subr.bf16.mxu0 %v770_v39  ;;  %687 = vmatpush3.bf16.msra.mxu1 %v524_v49  ;;  %v582_v55 = vld [vmem:[%s972_s2] ss:$0 sm:$0xff] }
  0x2a   :  { %688 = vmatprep.subr.bf16.mxu1 %v770_v39  ;;  %v745_v4 = vld [vmem:[%s975_s5] sm:$0xff]   ;;  %s574_s5 = sshll.u32 %s772_s12, 4  ;;  %s575_s5 = int_to_ptr.vmem [resolvable:$true] %s574_s5 }
  0x2b   :  { %v610_v5 = vld [vmem:[%s974_s4] ss:$0 sm:$0xff]  ;;  %s746_s4 = scalar_lea.vmem %s575_s5, 32  ;;  %p751_p1 = scmp.lt.s32.totalorder %s575_s5, %s575_s5 }
  0x2c   :  { %671 = vmatpush3.bf16.msra.mxu0 %v734_v42  ;;  %v620_v13 = vld [vmem:[%s976_s6] ss:$0 sm:$0xff]  ;;  %p747_p0 = scmp.ne.s32.totalorder %s575_s5, %s746_s4  ;;  %p752_p2 = scmp.lt.s32.totalorder %s746_s4, %s746_s4 }
  0x2d   :  { %672 = vmatprep.subr.bf16.mxu0 %v770_v39  ;;  %689 = vmatpush3.bf16.msra.mxu1 %v741_v50 }
  0x2e   :  { %690 = vmatprep.subr.bf16.mxu1 %v770_v39  ;;  %p753_p3 = por %p752_p2, %p751_p1 }
  0x30   :  { %673 = vmatpush3.bf16.msra.mxu0 %v735_v43  ;;  %p754_p4 = pnand %p753_p3, %p747_p0 }
  0x31   :  { %674 = vmatprep.subr.bf16.mxu0 %v770_v39  ;;  %691 = vmatpush3.bf16.msra.mxu1 %v742_v51 }
  0x32   :  { %692 = vmatprep.subr.bf16.mxu1 %v770_v39 }
  0x34   :  { %675 = vmatpush3.bf16.msra.mxu0 %v736_v44 }
  0x35   :  { %676 = vmatprep.subr.bf16.mxu0 %v770_v39  ;;  %693 = vmatpush3.bf16.msra.mxu1 %v743_v52 }
  0x36   :  { %694 = vmatprep.subr.bf16.mxu1 %v770_v39 }
  0x38   :  { %677 = vmatpush3.bf16.msra.mxu0 %v737_v45 }
  0x39   :  { %678 = vmatprep.subr.bf16.mxu0 %v770_v39  ;;  %695 = vmatpush3.bf16.msra.mxu1 %v744_v3 }
  0x3a   :  { %696 = vmatprep.subr.bf16.mxu1 %v770_v39 }
  0x3c   :  { %679 = vmatpush3.bf16.msra.mxu0 %v738_v46 }
  0x3d   :  { %680 = vmatprep.subr.bf16.mxu0 %v770_v39  ;;  %697 = vmatpush3.bf16.msra.mxu1 %v745_v4 }
  0x40   :  { %681 = vmatpush3.bf16.msra.mxu0 %v739_v47 }
  0xe3   :  { %v644_v53 = vpop.f32.mrf.mxu0 }
  0xe5   :  { %v645_v54 = vpop.f32.mrf.mxu0 }
  0xe6   :  { %v646_v56 = vadd.f32 %v645_v54, %v644_v53  ;;  %v342_v57 = vpop.f32.mrf.mxu1 }
  0xe7   :  { %v647_v58 = vpop.f32.mrf.mxu0 }
  0xe8   :  { %v303_v59 = vadd.f32 %v646_v56, %v582_v55  ;;  %v344_v60 = vpop.f32.mrf.mxu1 }
  0xe9   :  { %v648_v61 = vpop.f32.mrf.mxu0 }
  0xea   :  { %v343_v62 = vadd.f32 %v342_v57, %v303_v59  ;;  %v345_v63 = vpop.f32.mrf.mxu1 }
  0xec   :  { %v348_v0 = vmax.f32 %v343_v62, 0.0  ;;  %v346_v1 = vpop.f32.mrf.mxu1 }
  0xee   :  { %v349_v2 = vpack.c.bf16 %v348_v0, %v348_v0 }
  0xf0   :  { %683 = vmatmul.mubr.msk.bf16.vlgmr.msra.gmra.mxu0 %vm417_vm4, %v349_v2 }
 0x1b0   :  { %v459_v6 = vpop.f32.mrf.mxu0 }
 0x1b1   :  { %v460_v7 = vadd.f32 %v610_v5, %v459_v6 }
 0x1b2   :  { %v684_v8 = vpop.f32.mrf.mxu0 }
 0x1b3   :  { %v465_v9 = vmax.f32 %v460_v7, 0.0 }
 0x1b4   :  { %v462_v10 = vpop.f32.mrf.mxu0 }
 0x1b5   :  { %v466_v11 = vpack.c.bf16 %v465_v9, %v465_v9 }
 0x1b6   :  { %v685_v12 = vpop.f32.mrf.mxu0 }
 0x1b7   :  { %699 = vmatmul.mubr.msk.bf16.vlgmr.msra.gmra.mxu1 %vm518_vm5, %v466_v11 }
 0x277   :  { %v560_v14 = vpop.f32.mrf.mxu1 }
 0x278   :  { %v561_v15 = vadd.f32 %v620_v13, %v560_v14 }
 0x279   :  { %v700_v16 = vpop.f32.mrf.mxu1 }
 0x27a   :  { %567 = vst.msk [vmem:[#allocation2] sm:$0x3] %vm566_vm6, %v561_v15 }
 0x27b   :  { %v563_v17 = vpop.f32.mrf.mxu1 }
 0x27c   :  { %757 = shalt.err (!%p754_p4)
}
 0x27d   :  { %577 = dma.vmem_to_hbm [thread:$0]  %s575_s5, 32, %s977_s7, [#allocation3]   ;;  %v701_v18 = vpop.f32.mrf.mxu1 }
 0x27e   :  { %766 = dma.done.wait [#allocation3], 32  }
 0x27f   :  { %767 = vsyncadd [#allocation3], 4294967264 }
 0x280   :  { %581 = vsyncpa [#allocation3], 1 }

</bundles_post_ra>
